<compile_context>
chip_gen: v7x
topology: tpu7x:2x2x1
jax: 0.10.0
libtpu: 0.0.40
codegen_flags: <defaults>
</compile_context>

<pallas_src>
import math
import functools

import jax
import jax.numpy as jnp
from jax import lax
from jax.experimental import pallas as pl
from jax.experimental.pallas import tpu as pltpu


# ----------------------------------------------------------------------------
# Config (small, synthetic)
# ----------------------------------------------------------------------------
CONFIG = dict(
    vocab_size=100,
    max_position_embeddings=64,
    type_vocab_size=2,
    hidden_size=128,
    num_hidden_layers=2,
    num_attention_heads=4,
    intermediate_size=512,
    num_labels=3,
    layer_norm_eps=1e-12,
)

# Row indices inside the packed per-layer vector slab.
_V_BQKV, _V_BO, _V_LN1G, _V_LN1B, _V_B1, _V_B2, _V_LN2G, _V_LN2B = range(8)


# ----------------------------------------------------------------------------
# Fused encoder kernel: grid = (batch, layer); one invocation == one layer of
# one batch element.  Hidden state lives in x_scratch across the layer axis.
# ----------------------------------------------------------------------------
def _bert_encoder_kernel(
    hidden0_hbm,                       # pl.ANY ref (B, S, H) f32 (post-emb-LN)
    bias_ref,                          # (1, S) f32 additive attention bias
    wqkv_ref, wo_ref, w1_ref, w2_ref,  # per-layer bf16 weights (streamed)
    vec_ref,                           # (8, W) f32 packed per-layer vectors
    poolw_ref, poolb_ref,              # pooler (constant)
    pooled_ref,                        # out block (1, H)
    x_scratch, attn_scratch, dma_sem,  # VMEM scratch + DMA semaphore
    *, S, H, I, nh, eps,
):
    b = pl.program_id(0)
    l = pl.program_id(1)
    d = H // nh
    scale = 1.0 / math.sqrt(d)

    def layernorm(y, g, beta):
        mean = jnp.mean(y, axis=-1, keepdims=True)
        cen = y - mean
        var = jnp.mean(cen * cen, axis=-1, keepdims=True)
        return cen * lax.rsqrt(var + eps) * g + beta

    # Seed this batch's hidden state from HBM once (layer 0 only); avoids
    # pinning the embedding block in VMEM for the whole layer loop.
    @pl.when(l == 0)
    def _():
        cp = pltpu.make_async_copy(hidden0_hbm.at[b], x_scratch, dma_sem)
        cp.start()
        cp.wait()

    # Unpack the per-layer vector slab (single DMA per layer).
    vecs = vec_ref[...]                                  # (8, W) f32
    bqkv = vecs[_V_BQKV:_V_BQKV + 1, :3 * H]             # (1, 3H)
    bo = vecs[_V_BO:_V_BO + 1, :H]
    ln1g = vecs[_V_LN1G:_V_LN1G + 1, :H]
    ln1b = vecs[_V_LN1B:_V_LN1B + 1, :H]
    b1 = vecs[_V_B1:_V_B1 + 1, :I]
    b2 = vecs[_V_B2:_V_B2 + 1, :H]
    ln2g = vecs[_V_LN2G:_V_LN2G + 1, :H]
    ln2b = vecs[_V_LN2B:_V_LN2B + 1, :H]

    x = x_scratch[...]                                   # (S, H) f32

    # ---- fused QKV projection (bf16 MXU, f32 accumulate) ----
    qkv = jnp.dot(x.astype(jnp.bfloat16), wqkv_ref[...],
                  preferred_element_type=jnp.float32) + bqkv          # (S, 3H)

    bias = bias_ref[...]                                 # (1, S) f32, broadcasts

    q = qkv[:, 0:H].astype(jnp.bfloat16)
    k = qkv[:, H:2 * H].astype(jnp.bfloat16)
    v = qkv[:, 2 * H:3 * H].astype(jnp.bfloat16)

    # ---- per-head attention; head outputs stored into lane slices of a VMEM
    #      scratch so the O projection is ONE K=H matmul (no K=d folds).
    # TODO(synk): KV-tiled online softmax for real sequence lengths.
    for h in range(nh):                                   # nh small -> unrolled
        c0 = h * d
        qh = q[:, c0:c0 + d]                              # (S, d) bf16
        kh = k[:, c0:c0 + d]
        vh = v[:, c0:c0 + d]
        # NT contraction over head_dim (no k transpose relayout).
        s = lax.dot_general(qh, kh, (((1,), (1,)), ((), ())),
                            preferred_element_type=jnp.float32)       # (S, S)
        s = s * scale + bias
        m = jnp.max(s, axis=-1, keepdims=True)
        p = jnp.exp(s - m)
        denom = jnp.sum(p, axis=-1, keepdims=True)
        p = p * pl.reciprocal(denom, approx=True)
        o_h = jnp.dot(p.astype(jnp.bfloat16), vh,
                      preferred_element_type=jnp.float32)             # (S, d)
        attn_scratch[:, c0:c0 + d] = o_h

    attn_out = jnp.dot(attn_scratch[...].astype(jnp.bfloat16), wo_ref[...],
                       preferred_element_type=jnp.float32) + bo       # (S, H)

    # ---- residual + LayerNorm (fused) ----
    x = layernorm(x + attn_out, ln1g, ln1b)

    # ---- FFN: gelu_new, bf16 MXU, f32 epilogue ----
    h1 = jnp.dot(x.astype(jnp.bfloat16), w1_ref[...],
                 preferred_element_type=jnp.float32) + b1             # (S, I)
    h1 = 0.5 * h1 * (1.0 + jnp.tanh(0.7978845608028654 *
                                    (h1 + 0.044715 * h1 * h1 * h1)))
    mlp = jnp.dot(h1.astype(jnp.bfloat16), w2_ref[...],
                  preferred_element_type=jnp.float32) + b2            # (S, H)

    # ---- residual + LayerNorm (fused) ----
    x = layernorm(x + mlp, ln2g, ln2b)
    x_scratch[...] = x

    # ---- pooler on the final layer: tanh(CLS @ Wp + bp) ----
    @pl.when(l == pl.num_programs(1) - 1)
    def _():
        cls = x[0:1, :]                                   # [CLS] row, (1, H)
        pooled = jnp.tanh(
            jnp.dot(cls.astype(jnp.bfloat16), poolw_ref[...],
                    preferred_element_type=jnp.float32) + poolb_ref[...])
        pooled_ref[...] = pooled.astype(pooled_ref.dtype)


# ----------------------------------------------------------------------------
# Parameter initialization (deterministic, synthetic; stacked per-layer weights,
# per-layer small vectors packed into one (L, 8, W) slab).
# ----------------------------------------------------------------------------
def init_params(key, cfg):
    H = cfg["hidden_size"]
    I = cfg["intermediate_size"]
    L = cfg["num_hidden_layers"]
    std = 0.02
    keys = iter(jax.random.split(key, 20))

    def nrm(shape, dtype=jnp.float32):
        return (jax.random.normal(next(keys), shape, jnp.float32) * std).astype(dtype)

    # Per-layer small vectors (biases random-small so nothing trivially cancels).
    bqkv = nrm((L, 3 * H))
    bo = nrm((L, H))
    ln1_g = jnp.ones((L, H), jnp.float32)
    ln1_b = jnp.zeros((L, H), jnp.float32)
    b1 = nrm((L, I))
    b2 = nrm((L, H))
    ln2_g = jnp.ones((L, H), jnp.float32)
    ln2_b = jnp.zeros((L, H), jnp.float32)

    W = max(3 * H, I)

    def pad(v):
        return jnp.pad(v, ((0, 0), (0, W - v.shape[-1])))

    vecs = jnp.stack(
        [pad(bqkv), pad(bo), pad(ln1_g), pad(ln1_b),
         pad(b1), pad(b2), pad(ln2_g), pad(ln2_b)], axis=1)   # (L, 8, W) f32

    return dict(
        word_emb=nrm((cfg["vocab_size"], H)),
        pos_emb=nrm((cfg["max_position_embeddings"], H)),
        tok_emb=nrm((cfg["type_vocab_size"], H)),
        emb_ln_g=jnp.ones((H,), jnp.float32),
        emb_ln_b=jnp.zeros((H,), jnp.float32),
        wqkv=nrm((L, H, 3 * H), jnp.bfloat16),
        wo=nrm((L, H, H), jnp.bfloat16),
        w1=nrm((L, H, I), jnp.bfloat16),
        w2=nrm((L, I, H), jnp.bfloat16),
        vecs=vecs,
        pooler_w=nrm((H, H), jnp.bfloat16),
        pooler_b=nrm((1, H)),
        cls_w=nrm((H, cfg["num_labels"])),
        cls_b=jnp.zeros((cfg["num_labels"],), jnp.float32),
    )


# ----------------------------------------------------------------------------
# Forward pass
# ----------------------------------------------------------------------------
def flash_bert_forward(params, input_ids, attention_mask=None,
                       token_type_ids=None, position_ids=None, *, cfg):
    B, S = input_ids.shape
    H = cfg["hidden_size"]
    I = cfg["intermediate_size"]
    nh = cfg["num_attention_heads"]
    L = cfg["num_hidden_layers"]
    eps = cfg["layer_norm_eps"]
    W = max(3 * H, I)

    if attention_mask is None:
        attention_mask = jnp.ones((B, S), jnp.int32)
    if token_type_ids is None:
        token_type_ids = jnp.zeros((B, S), jnp.int32)
    if position_ids is None:
        position_ids = jnp.broadcast_to(jnp.arange(S, dtype=jnp.int32), (B, S))

    # Embedding gather + embedding LayerNorm in plain JAX (memory-bound
    # elementwise; keeps the raw emb block out of kernel VMEM).
    emb = (params["word_emb"][input_ids]
           + params["pos_emb"][position_ids]
           + params["tok_emb"][token_type_ids])                       # (B, S, H)
    mu = jnp.mean(emb, axis=-1, keepdims=True)
    var = jnp.mean((emb - mu) ** 2, axis=-1, keepdims=True)
    hidden0 = ((emb - mu) * lax.rsqrt(var + eps)
               * params["emb_ln_g"] + params["emb_ln_b"]).astype(jnp.float32)

    # Additive attention bias: 0 for real tokens, -1e9 for padding (f32).
    bias = ((1.0 - attention_mask.astype(jnp.float32)) * -1e9).reshape(B, 1, S)

    kernel = functools.partial(_bert_encoder_kernel, S=S, H=H, I=I, nh=nh, eps=eps)

    # Explicit VMEM budget from actual block footprint (double-buffered weights).
    wbytes = 2 * 2 * (H * 3 * H + H * H + H * I + I * H)   # bf16 layer weights x2
    vbytes = 2 * 4 * (8 * W)                               # packed vectors x2
    cbytes = 2 * (H * H * 2 + H * 4 + S * 4)               # pooler + bias blocks
    sbytes = 2 * (S * H * 4)                               # x_scratch + attn_scratch
    obytes = 2 * (H * 4)                                   # pooled out block
    vmem_limit = max(int(1.5 * (wbytes + vbytes + cbytes + sbytes + obytes))
                     + (2 << 20), 4 << 20)

    pooled = pl.pallas_call(
        kernel,
        grid=(B, L),
        in_specs=[
            pl.BlockSpec(memory_space=pl.ANY),                         # hidden0 (HBM)
            pl.BlockSpec((None, 1, S), lambda b, l: (b, 0, 0)),        # bias
            pl.BlockSpec((None, H, 3 * H), lambda b, l: (l, 0, 0)),    # wqkv
            pl.BlockSpec((None, H, H), lambda b, l: (l, 0, 0)),        # wo
            pl.BlockSpec((None, H, I), lambda b, l: (l, 0, 0)),        # w1
            pl.BlockSpec((None, I, H), lambda b, l: (l, 0, 0)),        # w2
            pl.BlockSpec((None, 8, W), lambda b, l: (l, 0, 0)),        # packed vectors
            pl.BlockSpec((H, H), lambda b, l: (0, 0)),                 # pooler_w
            pl.BlockSpec((1, H), lambda b, l: (0, 0)),                 # pooler_b
        ],
        out_specs=pl.BlockSpec((None, 1, H), lambda b, l: (b, 0, 0)),
        out_shape=jax.ShapeDtypeStruct((B, 1, H), jnp.float32),
        scratch_shapes=[
            pltpu.VMEM((S, H), jnp.float32),     # hidden state (per batch)
            pltpu.VMEM((S, H), jnp.float32),     # attention head-output slab
            pltpu.SemaphoreType.DMA(()),         # layer-0 seed DMA
        ],
        compiler_params=pltpu.CompilerParams(
            dimension_semantics=("parallel", "arbitrary"),
            vmem_limit_bytes=vmem_limit),
    )(hidden0, bias, params["wqkv"], params["wo"], params["w1"], params["w2"],
      params["vecs"], params["pooler_w"], params["pooler_b"])

    pooled = pooled.reshape(B, H)

    # Classifier head (num_labels=3 -> lane-sparse): plain JAX.
    # (dropout is an inference no-op.)
    logits = pooled @ params["cls_w"] + params["cls_b"]                # (B, num_labels)
    return logits


# ----------------------------------------------------------------------------
# Main
# ----------------------------------------------------------------------------
if __name__ == "__main__":
    cfg = CONFIG
    key = jax.random.PRNGKey(0)
    k_params, k_ids = jax.random.split(key)

    params = init_params(k_params, cfg)

    B, S = 2, 16
    input_ids = jax.random.randint(k_ids, (B, S), 0, cfg["vocab_size"], dtype=jnp.int32)
    # Mask out the last 4 tokens of the second sequence (padding).
    attention_mask = jnp.ones((B, S), jnp.int32).at[1, S - 4:].set(0)

    fwd = jax.jit(functools.partial(flash_bert_forward, cfg=cfg))
    logits = fwd(params, input_ids, attention_mask)
    logits = jax.block_until_ready(logits)

    assert logits.shape == (B, cfg["num_labels"])
    assert bool(jnp.all(jnp.isfinite(logits)))
    print("KERNEL_OK")
</pallas_src>

<mosaic_0001>
module attributes {stable_mosaic.version = 11 : i64} {
  func.func @_bert_encoder_kernel(%arg0: i32, %arg1: i32, %arg2: memref<2x16x128xf32, #tpu.memory_space<any>>, %arg3: memref<1x1x16xf32, #tpu.memory_space<vmem>>, %arg4: memref<1x128x384xbf16, #tpu.memory_space<vmem>>, %arg5: memref<1x128x128xbf16, #tpu.memory_space<vmem>>, %arg6: memref<1x128x512xbf16, #tpu.memory_space<vmem>>, %arg7: memref<1x512x128xbf16, #tpu.memory_space<vmem>>, %arg8: memref<1x8x512xf32, #tpu.memory_space<vmem>>, %arg9: memref<128x128xbf16, #tpu.memory_space<vmem>>, %arg10: memref<1x128xf32, #tpu.memory_space<vmem>>, %arg11: memref<1x1x128xf32, #tpu.memory_space<vmem>>, %arg12: memref<16x128xf32, #tpu.memory_space<vmem>>, %arg13: memref<16x128xf32, #tpu.memory_space<vmem>>, %arg14: memref<!tpu.dma_semaphore, #tpu.memory_space<semaphore_mem>>) attributes {dimension_semantics = [#tpu.dimension_semantics<parallel>, #tpu.dimension_semantics<arbitrary>], iteration_bounds = array<i64: 2, 2>, scalar_prefetch = 0 : i64, scratch_operands = 3 : i64, tpu.core_type = #tpu.core_type<tc>, window_params = [{}, {transform_indices = @transform_1, window_bounds = array<i64: 1, 1, 16>}, {transform_indices = @transform_2, window_bounds = array<i64: 1, 128, 384>}, {transform_indices = @transform_3, window_bounds = array<i64: 1, 128, 128>}, {transform_indices = @transform_4, window_bounds = array<i64: 1, 128, 512>}, {transform_indices = @transform_5, window_bounds = array<i64: 1, 512, 128>}, {transform_indices = @transform_6, window_bounds = array<i64: 1, 8, 512>}, {pipeline_mode = #tpu.pipeline_mode<synchronous>, transform_indices = @transform_7, window_bounds = array<i64: 128, 128>}, {pipeline_mode = #tpu.pipeline_mode<synchronous>, transform_indices = @transform_8, window_bounds = array<i64: 1, 128>}, {transform_indices = @transform_9, window_bounds = array<i64: 1, 1, 128>}]} {
    %c0_i32 = arith.constant 0 : i32
    %0 = arith.cmpi eq, %arg1, %c0_i32 : i32
    %1 = arith.extui %0 : i1 to i32
    %c0_i32_0 = arith.constant 0 : i32
    %2 = arith.cmpi ne, %1, %c0_i32_0 : i32
    scf.if %2 {
      %c0_i32_67 = arith.constant 0 : i32
      %c0_i32_68 = arith.constant 0 : i32
      %190 = tpu.memref_slice %arg2[%arg0, %c0_i32_67, %c0_i32_68] : memref<2x16x128xf32, #tpu.memory_space<any>> -> memref<1x16x128xf32, #tpu.memory_space<any>>
      %191 = tpu.memref_squeeze %190 : memref<1x16x128xf32, #tpu.memory_space<any>> -> memref<16x128xf32, #tpu.memory_space<any>>
      tpu.enqueue_dma source(%191 : memref<16x128xf32, #tpu.memory_space<any>>) target(%arg12 : memref<16x128xf32, #tpu.memory_space<vmem>>) target_semaphore(%arg14 : memref<!tpu.dma_semaphore, #tpu.memory_space<semaphore_mem>>)
      %c0_i32_69 = arith.constant 0 : i32
      %c0_i32_70 = arith.constant 0 : i32
      %192 = tpu.memref_slice %arg2[%arg0, %c0_i32_69, %c0_i32_70] : memref<2x16x128xf32, #tpu.memory_space<any>> -> memref<1x16x128xf32, #tpu.memory_space<any>>
      %193 = tpu.memref_squeeze %192 : memref<1x16x128xf32, #tpu.memory_space<any>> -> memref<16x128xf32, #tpu.memory_space<any>>
      tpu.wait_dma2 semaphore(%arg14 : memref<!tpu.dma_semaphore, #tpu.memory_space<semaphore_mem>>) src(%193 : memref<16x128xf32, #tpu.memory_space<any>>) dst(%arg12 : memref<16x128xf32, #tpu.memory_space<vmem>>)
    } else {
    }
    %c0 = arith.constant 0 : index
    %c0_1 = arith.constant 0 : index
    %c0_2 = arith.constant 0 : index
    %3 = vector.load %arg8[%c0, %c0_1, %c0_2] : memref<1x8x512xf32, #tpu.memory_space<vmem>>, vector<1x8x512xf32>
    %4 = vector.shape_cast %3 : vector<1x8x512xf32> to vector<8x512xf32>
    %5 = vector.extract_strided_slice %4 {offsets = [0, 0], sizes = [1, 384], strides = [1, 1]} : vector<8x512xf32> to vector<1x384xf32>
    %6 = vector.extract_strided_slice %4 {offsets = [1, 0], sizes = [1, 128], strides = [1, 1]} : vector<8x512xf32> to vector<1x128xf32>
    %7 = vector.extract_strided_slice %4 {offsets = [2, 0], sizes = [1, 128], strides = [1, 1]} : vector<8x512xf32> to vector<1x128xf32>
    %8 = vector.extract_strided_slice %4 {offsets = [3, 0], sizes = [1, 128], strides = [1, 1]} : vector<8x512xf32> to vector<1x128xf32>
    %9 = vector.extract_strided_slice %4 {offsets = [4, 0], sizes = [1, 512], strides = [1, 1]} : vector<8x512xf32> to vector<1x512xf32>
    %10 = vector.extract_strided_slice %4 {offsets = [5, 0], sizes = [1, 128], strides = [1, 1]} : vector<8x512xf32> to vector<1x128xf32>
    %11 = vector.extract_strided_slice %4 {offsets = [6, 0], sizes = [1, 128], strides = [1, 1]} : vector<8x512xf32> to vector<1x128xf32>
    %12 = vector.extract_strided_slice %4 {offsets = [7, 0], sizes = [1, 128], strides = [1, 1]} : vector<8x512xf32> to vector<1x128xf32>
    %c0_3 = arith.constant 0 : index
    %c0_4 = arith.constant 0 : index
    %13 = vector.load %arg12[%c0_3, %c0_4] : memref<16x128xf32, #tpu.memory_space<vmem>>, vector<16x128xf32>
    %14 = arith.truncf %13 : vector<16x128xf32> to vector<16x128xbf16>
    %c0_5 = arith.constant 0 : index
    %c0_6 = arith.constant 0 : index
    %c0_7 = arith.constant 0 : index
    %15 = vector.load %arg4[%c0_5, %c0_6, %c0_7] : memref<1x128x384xbf16, #tpu.memory_space<vmem>>, vector<1x128x384xbf16>
    %16 = vector.shape_cast %15 : vector<1x128x384xbf16> to vector<128x384xbf16>
    %cst = arith.constant dense<0.000000e+00> : vector<16x384xf32>
    %17 = tpu.matmul %14, %16, %cst {dimension_numbers = #tpu.dot_dimension_numbers<[1], [0], [0], [1], [0, 0, 1, 1], [], []>} : vector<16x128xbf16>, vector<128x384xbf16>, vector<16x384xf32> -> vector<16x384xf32>
    %18 = vector.broadcast %5 : vector<1x384xf32> to vector<16x384xf32>
    %19 = arith.addf %17, %18 : vector<16x384xf32>
    %c0_8 = arith.constant 0 : index
    %c0_9 = arith.constant 0 : index
    %c0_10 = arith.constant 0 : index
    %20 = vector.load %arg3[%c0_8, %c0_9, %c0_10] : memref<1x1x16xf32, #tpu.memory_space<vmem>>, vector<1x1x16xf32>
    %21 = vector.shape_cast %20 : vector<1x1x16xf32> to vector<1x16xf32>
    %22 = vector.extract_strided_slice %19 {offsets = [0, 0], sizes = [16, 128], strides = [1, 1]} : vector<16x384xf32> to vector<16x128xf32>
    %23 = arith.truncf %22 : vector<16x128xf32> to vector<16x128xbf16>
    %24 = vector.extract_strided_slice %19 {offsets = [0, 128], sizes = [16, 128], strides = [1, 1]} : vector<16x384xf32> to vector<16x128xf32>
    %25 = arith.truncf %24 : vector<16x128xf32> to vector<16x128xbf16>
    %26 = vector.extract_strided_slice %19 {offsets = [0, 256], sizes = [16, 128], strides = [1, 1]} : vector<16x384xf32> to vector<16x128xf32>
    %27 = arith.truncf %26 : vector<16x128xf32> to vector<16x128xbf16>
    %28 = vector.extract_strided_slice %23 {offsets = [0, 0], sizes = [16, 32], strides = [1, 1]} : vector<16x128xbf16> to vector<16x32xbf16>
    %29 = vector.extract_strided_slice %25 {offsets = [0, 0], sizes = [16, 32], strides = [1, 1]} : vector<16x128xbf16> to vector<16x32xbf16>
    %30 = vector.extract_strided_slice %27 {offsets = [0, 0], sizes = [16, 32], strides = [1, 1]} : vector<16x128xbf16> to vector<16x32xbf16>
    %cst_11 = arith.constant dense<0.000000e+00> : vector<16x16xf32>
    %31 = tpu.matmul %28, %29, %cst_11 {dimension_numbers = #tpu.dot_dimension_numbers<[1], [1], [0], [0], [0, 0, 1, 0], [], []>} : vector<16x32xbf16>, vector<16x32xbf16>, vector<16x16xf32> -> vector<16x16xf32>
    %cst_12 = arith.constant 0.176776692 : f32
    %32 = vector.broadcast %cst_12 : f32 to vector<16x16xf32>
    %33 = arith.mulf %31, %32 : vector<16x16xf32>
    %34 = vector.broadcast %21 : vector<1x16xf32> to vector<16x16xf32>
    %35 = arith.addf %33, %34 : vector<16x16xf32>
    %cst_13 = arith.constant dense<0xFF800000> : vector<16xf32>
    %36 = vector.multi_reduction <maximumf>, %35, %cst_13 [1] : vector<16x16xf32> to vector<16xf32>
    %37 = vector.shape_cast %36 : vector<16xf32> to vector<16x1xf32>
    %38 = vector.broadcast %37 : vector<16x1xf32> to vector<16x16xf32>
    %39 = arith.subf %35, %38 : vector<16x16xf32>
    %40 = math.exp %39 : vector<16x16xf32>
    %cst_14 = arith.constant dense<0.000000e+00> : vector<16xf32>
    %41 = vector.multi_reduction <add>, %40, %cst_14 [1] : vector<16x16xf32> to vector<16xf32>
    %42 = vector.shape_cast %41 : vector<16xf32> to vector<16x1xf32>
    %43 = tpu.reciprocal %42 {approx = true} : vector<16x1xf32> -> vector<16x1xf32>
    %44 = vector.broadcast %43 : vector<16x1xf32> to vector<16x16xf32>
    %45 = arith.mulf %40, %44 : vector<16x16xf32>
    %46 = arith.truncf %45 : vector<16x16xf32> to vector<16x16xbf16>
    %cst_15 = arith.constant dense<0.000000e+00> : vector<16x32xf32>
    %47 = tpu.matmul %46, %30, %cst_15 {dimension_numbers = #tpu.dot_dimension_numbers<[1], [0], [0], [1], [0, 0, 1, 1], [], []>} : vector<16x16xbf16>, vector<16x32xbf16>, vector<16x32xf32> -> vector<16x32xf32>
    %c0_16 = arith.constant 0 : index
    %c0_17 = arith.constant 0 : index
    %48 = vector.load %arg13[%c0_16, %c0_17] : memref<16x128xf32, #tpu.memory_space<vmem>>, vector<16x32xf32>
    tpu.vector_store %arg13[%c0_16, %c0_17], %47 {strides = array<i32>} : memref<16x128xf32, #tpu.memory_space<vmem>>, vector<16x32xf32>,
    %49 = vector.extract_strided_slice %23 {offsets = [0, 32], sizes = [16, 32], strides = [1, 1]} : vector<16x128xbf16> to vector<16x32xbf16>
    %50 = vector.extract_strided_slice %25 {offsets = [0, 32], sizes = [16, 32], strides = [1, 1]} : vector<16x128xbf16> to vector<16x32xbf16>
    %51 = vector.extract_strided_slice %27 {offsets = [0, 32], sizes = [16, 32], strides = [1, 1]} : vector<16x128xbf16> to vector<16x32xbf16>
    %cst_18 = arith.constant dense<0.000000e+00> : vector<16x16xf32>
    %52 = tpu.matmul %49, %50, %cst_18 {dimension_numbers = #tpu.dot_dimension_numbers<[1], [1], [0], [0], [0, 0, 1, 0], [], []>} : vector<16x32xbf16>, vector<16x32xbf16>, vector<16x16xf32> -> vector<16x16xf32>
    %cst_19 = arith.constant 0.176776692 : f32
    %53 = vector.broadcast %cst_19 : f32 to vector<16x16xf32>
    %54 = arith.mulf %52, %53 : vector<16x16xf32>
    %55 = vector.broadcast %21 : vector<1x16xf32> to vector<16x16xf32>
    %56 = arith.addf %54, %55 : vector<16x16xf32>
    %cst_20 = arith.constant dense<0xFF800000> : vector<16xf32>
    %57 = vector.multi_reduction <maximumf>, %56, %cst_20 [1] : vector<16x16xf32> to vector<16xf32>
    %58 = vector.shape_cast %57 : vector<16xf32> to vector<16x1xf32>
    %59 = vector.broadcast %58 : vector<16x1xf32> to vector<16x16xf32>
    %60 = arith.subf %56, %59 : vector<16x16xf32>
    %61 = math.exp %60 : vector<16x16xf32>
    %cst_21 = arith.constant dense<0.000000e+00> : vector<16xf32>
    %62 = vector.multi_reduction <add>, %61, %cst_21 [1] : vector<16x16xf32> to vector<16xf32>
    %63 = vector.shape_cast %62 : vector<16xf32> to vector<16x1xf32>
    %64 = tpu.reciprocal %63 {approx = true} : vector<16x1xf32> -> vector<16x1xf32>
    %65 = vector.broadcast %64 : vector<16x1xf32> to vector<16x16xf32>
    %66 = arith.mulf %61, %65 : vector<16x16xf32>
    %67 = arith.truncf %66 : vector<16x16xf32> to vector<16x16xbf16>
    %cst_22 = arith.constant dense<0.000000e+00> : vector<16x32xf32>
    %68 = tpu.matmul %67, %51, %cst_22 {dimension_numbers = #tpu.dot_dimension_numbers<[1], [0], [0], [1], [0, 0, 1, 1], [], []>} : vector<16x16xbf16>, vector<16x32xbf16>, vector<16x32xf32> -> vector<16x32xf32>
    %c0_23 = arith.constant 0 : index
    %c32 = arith.constant 32 : index
    %69 = vector.load %arg13[%c0_23, %c32] : memref<16x128xf32, #tpu.memory_space<vmem>>, vector<16x32xf32>
    tpu.vector_store %arg13[%c0_23, %c32], %68 {strides = array<i32>} : memref<16x128xf32, #tpu.memory_space<vmem>>, vector<16x32xf32>,
    %70 = vector.extract_strided_slice %23 {offsets = [0, 64], sizes = [16, 32], strides = [1, 1]} : vector<16x128xbf16> to vector<16x32xbf16>
    %71 = vector.extract_strided_slice %25 {offsets = [0, 64], sizes = [16, 32], strides = [1, 1]} : vector<16x128xbf16> to vector<16x32xbf16>
    %72 = vector.extract_strided_slice %27 {offsets = [0, 64], sizes = [16, 32], strides = [1, 1]} : vector<16x128xbf16> to vector<16x32xbf16>
    %cst_24 = arith.constant dense<0.000000e+00> : vector<16x16xf32>
    %73 = tpu.matmul %70, %71, %cst_24 {dimension_numbers = #tpu.dot_dimension_numbers<[1], [1], [0], [0], [0, 0, 1, 0], [], []>} : vector<16x32xbf16>, vector<16x32xbf16>, vector<16x16xf32> -> vector<16x16xf32>
    %cst_25 = arith.constant 0.176776692 : f32
    %74 = vector.broadcast %cst_25 : f32 to vector<16x16xf32>
    %75 = arith.mulf %73, %74 : vector<16x16xf32>
    %76 = vector.broadcast %21 : vector<1x16xf32> to vector<16x16xf32>
    %77 = arith.addf %75, %76 : vector<16x16xf32>
    %cst_26 = arith.constant dense<0xFF800000> : vector<16xf32>
    %78 = vector.multi_reduction <maximumf>, %77, %cst_26 [1] : vector<16x16xf32> to vector<16xf32>
    %79 = vector.shape_cast %78 : vector<16xf32> to vector<16x1xf32>
    %80 = vector.broadcast %79 : vector<16x1xf32> to vector<16x16xf32>
    %81 = arith.subf %77, %80 : vector<16x16xf32>
    %82 = math.exp %81 : vector<16x16xf32>
    %cst_27 = arith.constant dense<0.000000e+00> : vector<16xf32>
    %83 = vector.multi_reduction <add>, %82, %cst_27 [1] : vector<16x16xf32> to vector<16xf32>
    %84 = vector.shape_cast %83 : vector<16xf32> to vector<16x1xf32>
    %85 = tpu.reciprocal %84 {approx = true} : vector<16x1xf32> -> vector<16x1xf32>
    %86 = vector.broadcast %85 : vector<16x1xf32> to vector<16x16xf32>
    %87 = arith.mulf %82, %86 : vector<16x16xf32>
    %88 = arith.truncf %87 : vector<16x16xf32> to vector<16x16xbf16>
    %cst_28 = arith.constant dense<0.000000e+00> : vector<16x32xf32>
    %89 = tpu.matmul %88, %72, %cst_28 {dimension_numbers = #tpu.dot_dimension_numbers<[1], [0], [0], [1], [0, 0, 1, 1], [], []>} : vector<16x16xbf16>, vector<16x32xbf16>, vector<16x32xf32> -> vector<16x32xf32>
    %c0_29 = arith.constant 0 : index
    %c64 = arith.constant 64 : index
    %90 = vector.load %arg13[%c0_29, %c64] : memref<16x128xf32, #tpu.memory_space<vmem>>, vector<16x32xf32>
    tpu.vector_store %arg13[%c0_29, %c64], %89 {strides = array<i32>} : memref<16x128xf32, #tpu.memory_space<vmem>>, vector<16x32xf32>,
    %91 = vector.extract_strided_slice %23 {offsets = [0, 96], sizes = [16, 32], strides = [1, 1]} : vector<16x128xbf16> to vector<16x32xbf16>
    %92 = vector.extract_strided_slice %25 {offsets = [0, 96], sizes = [16, 32], strides = [1, 1]} : vector<16x128xbf16> to vector<16x32xbf16>
    %93 = vector.extract_strided_slice %27 {offsets = [0, 96], sizes = [16, 32], strides = [1, 1]} : vector<16x128xbf16> to vector<16x32xbf16>
    %cst_30 = arith.constant dense<0.000000e+00> : vector<16x16xf32>
    %94 = tpu.matmul %91, %92, %cst_30 {dimension_numbers = #tpu.dot_dimension_numbers<[1], [1], [0], [0], [0, 0, 1, 0], [], []>} : vector<16x32xbf16>, vector<16x32xbf16>, vector<16x16xf32> -> vector<16x16xf32>
    %cst_31 = arith.constant 0.176776692 : f32
    %95 = vector.broadcast %cst_31 : f32 to vector<16x16xf32>
    %96 = arith.mulf %94, %95 : vector<16x16xf32>
    %97 = vector.broadcast %21 : vector<1x16xf32> to vector<16x16xf32>
    %98 = arith.addf %96, %97 : vector<16x16xf32>
    %cst_32 = arith.constant dense<0xFF800000> : vector<16xf32>
    %99 = vector.multi_reduction <maximumf>, %98, %cst_32 [1] : vector<16x16xf32> to vector<16xf32>
    %100 = vector.shape_cast %99 : vector<16xf32> to vector<16x1xf32>
    %101 = vector.broadcast %100 : vector<16x1xf32> to vector<16x16xf32>
    %102 = arith.subf %98, %101 : vector<16x16xf32>
    %103 = math.exp %102 : vector<16x16xf32>
    %cst_33 = arith.constant dense<0.000000e+00> : vector<16xf32>
    %104 = vector.multi_reduction <add>, %103, %cst_33 [1] : vector<16x16xf32> to vector<16xf32>
    %105 = vector.shape_cast %104 : vector<16xf32> to vector<16x1xf32>
    %106 = tpu.reciprocal %105 {approx = true} : vector<16x1xf32> -> vector<16x1xf32>
    %107 = vector.broadcast %106 : vector<16x1xf32> to vector<16x16xf32>
    %108 = arith.mulf %103, %107 : vector<16x16xf32>
    %109 = arith.truncf %108 : vector<16x16xf32> to vector<16x16xbf16>
    %cst_34 = arith.constant dense<0.000000e+00> : vector<16x32xf32>
    %110 = tpu.matmul %109, %93, %cst_34 {dimension_numbers = #tpu.dot_dimension_numbers<[1], [0], [0], [1], [0, 0, 1, 1], [], []>} : vector<16x16xbf16>, vector<16x32xbf16>, vector<16x32xf32> -> vector<16x32xf32>
    %c0_35 = arith.constant 0 : index
    %c96 = arith.constant 96 : index
    %111 = vector.load %arg13[%c0_35, %c96] : memref<16x128xf32, #tpu.memory_space<vmem>>, vector<16x32xf32>
    tpu.vector_store %arg13[%c0_35, %c96], %110 {strides = array<i32>} : memref<16x128xf32, #tpu.memory_space<vmem>>, vector<16x32xf32>,
    %c0_36 = arith.constant 0 : index
    %c0_37 = arith.constant 0 : index
    %112 = vector.load %arg13[%c0_36, %c0_37] : memref<16x128xf32, #tpu.memory_space<vmem>>, vector<16x128xf32>
    %113 = arith.truncf %112 : vector<16x128xf32> to vector<16x128xbf16>
    %c0_38 = arith.constant 0 : index
    %c0_39 = arith.constant 0 : index
    %c0_40 = arith.constant 0 : index
    %114 = vector.load %arg5[%c0_38, %c0_39, %c0_40] : memref<1x128x128xbf16, #tpu.memory_space<vmem>>, vector<1x128x128xbf16>
    %115 = vector.shape_cast %114 : vector<1x128x128xbf16> to vector<128x128xbf16>
    %cst_41 = arith.constant dense<0.000000e+00> : vector<16x128xf32>
    %116 = tpu.matmul %113, %115, %cst_41 {dimension_numbers = #tpu.dot_dimension_numbers<[1], [0], [0], [1], [0, 0, 1, 1], [], []>} : vector<16x128xbf16>, vector<128x128xbf16>, vector<16x128xf32> -> vector<16x128xf32>
    %117 = vector.broadcast %6 : vector<1x128xf32> to vector<16x128xf32>
    %118 = arith.addf %116, %117 : vector<16x128xf32>
    %119 = arith.addf %13, %118 : vector<16x128xf32>
    %cst_42 = arith.constant dense<0.000000e+00> : vector<16xf32>
    %120 = vector.multi_reduction <add>, %119, %cst_42 [1] : vector<16x128xf32> to vector<16xf32>
    %121 = vector.shape_cast %120 : vector<16xf32> to vector<16x1xf32>
    %cst_43 = arith.constant 1.280000e+02 : f32
    %122 = vector.broadcast %cst_43 : f32 to vector<16x1xf32>
    %123 = arith.divf %121, %122 : vector<16x1xf32>
    %124 = vector.broadcast %123 : vector<16x1xf32> to vector<16x128xf32>
    %125 = arith.subf %119, %124 : vector<16x128xf32>
    %126 = arith.mulf %125, %125 : vector<16x128xf32>
    %cst_44 = arith.constant dense<0.000000e+00> : vector<16xf32>
    %127 = vector.multi_reduction <add>, %126, %cst_44 [1] : vector<16x128xf32> to vector<16xf32>
    %128 = vector.shape_cast %127 : vector<16xf32> to vector<16x1xf32>
    %cst_45 = arith.constant 1.280000e+02 : f32
    %129 = vector.broadcast %cst_45 : f32 to vector<16x1xf32>
    %130 = arith.divf %128, %129 : vector<16x1xf32>
    %cst_46 = arith.constant 9.99999996E-13 : f32
    %131 = vector.broadcast %cst_46 : f32 to vector<16x1xf32>
    %132 = arith.addf %130, %131 : vector<16x1xf32>
    %133 = math.rsqrt %132 : vector<16x1xf32>
    %134 = vector.broadcast %133 : vector<16x1xf32> to vector<16x128xf32>
    %135 = arith.mulf %125, %134 : vector<16x128xf32>
    %136 = vector.broadcast %7 : vector<1x128xf32> to vector<16x128xf32>
    %137 = arith.mulf %135, %136 : vector<16x128xf32>
    %138 = vector.broadcast %8 : vector<1x128xf32> to vector<16x128xf32>
    %139 = arith.addf %137, %138 : vector<16x128xf32>
    %140 = arith.truncf %139 : vector<16x128xf32> to vector<16x128xbf16>
    %c0_47 = arith.constant 0 : index
    %c0_48 = arith.constant 0 : index
    %c0_49 = arith.constant 0 : index
    %141 = vector.load %arg6[%c0_47, %c0_48, %c0_49] : memref<1x128x512xbf16, #tpu.memory_space<vmem>>, vector<1x128x512xbf16>
    %142 = vector.shape_cast %141 : vector<1x128x512xbf16> to vector<128x512xbf16>
    %cst_50 = arith.constant dense<0.000000e+00> : vector<16x512xf32>
    %143 = tpu.matmul %140, %142, %cst_50 {dimension_numbers = #tpu.dot_dimension_numbers<[1], [0], [0], [1], [0, 0, 1, 1], [], []>} : vector<16x128xbf16>, vector<128x512xbf16>, vector<16x512xf32> -> vector<16x512xf32>
    %144 = vector.broadcast %9 : vector<1x512xf32> to vector<16x512xf32>
    %145 = arith.addf %143, %144 : vector<16x512xf32>
    %cst_51 = arith.constant 5.000000e-01 : f32
    %146 = vector.broadcast %cst_51 : f32 to vector<16x512xf32>
    %147 = arith.mulf %146, %145 : vector<16x512xf32>
    %cst_52 = arith.constant 4.471500e-02 : f32
    %148 = vector.broadcast %cst_52 : f32 to vector<16x512xf32>
    %149 = arith.mulf %148, %145 : vector<16x512xf32>
    %150 = arith.mulf %149, %145 : vector<16x512xf32>
    %151 = arith.mulf %150, %145 : vector<16x512xf32>
    %152 = arith.addf %145, %151 : vector<16x512xf32>
    %cst_53 = arith.constant 0.797884583 : f32
    %153 = vector.broadcast %cst_53 : f32 to vector<16x512xf32>
    %154 = arith.mulf %153, %152 : vector<16x512xf32>
    %155 = math.tanh %154 : vector<16x512xf32>
    %cst_54 = arith.constant 1.000000e+00 : f32
    %156 = vector.broadcast %cst_54 : f32 to vector<16x512xf32>
    %157 = arith.addf %156, %155 : vector<16x512xf32>
    %158 = arith.mulf %147, %157 : vector<16x512xf32>
    %159 = arith.truncf %158 : vector<16x512xf32> to vector<16x512xbf16>
    %c0_55 = arith.constant 0 : index
    %c0_56 = arith.constant 0 : index
    %c0_57 = arith.constant 0 : index
    %160 = vector.load %arg7[%c0_55, %c0_56, %c0_57] : memref<1x512x128xbf16, #tpu.memory_space<vmem>>, vector<1x512x128xbf16>
    %161 = vector.shape_cast %160 : vector<1x512x128xbf16> to vector<512x128xbf16>
    %cst_58 = arith.constant dense<0.000000e+00> : vector<16x128xf32>
    %162 = tpu.matmul %159, %161, %cst_58 {dimension_numbers = #tpu.dot_dimension_numbers<[1], [0], [0], [1], [0, 0, 1, 1], [], []>} : vector<16x512xbf16>, vector<512x128xbf16>, vector<16x128xf32> -> vector<16x128xf32>
    %163 = vector.broadcast %10 : vector<1x128xf32> to vector<16x128xf32>
    %164 = arith.addf %162, %163 : vector<16x128xf32>
    %165 = arith.addf %139, %164 : vector<16x128xf32>
    %cst_59 = arith.constant dense<0.000000e+00> : vector<16xf32>
    %166 = vector.multi_reduction <add>, %165, %cst_59 [1] : vector<16x128xf32> to vector<16xf32>
    %167 = vector.shape_cast %166 : vector<16xf32> to vector<16x1xf32>
    %cst_60 = arith.constant 1.280000e+02 : f32
    %168 = vector.broadcast %cst_60 : f32 to vector<16x1xf32>
    %169 = arith.divf %167, %168 : vector<16x1xf32>
    %170 = vector.broadcast %169 : vector<16x1xf32> to vector<16x128xf32>
    %171 = arith.subf %165, %170 : vector<16x128xf32>
    %172 = arith.mulf %171, %171 : vector<16x128xf32>
    %cst_61 = arith.constant dense<0.000000e+00> : vector<16xf32>
    %173 = vector.multi_reduction <add>, %172, %cst_61 [1] : vector<16x128xf32> to vector<16xf32>
    %174 = vector.shape_cast %173 : vector<16xf32> to vector<16x1xf32>
    %cst_62 = arith.constant 1.280000e+02 : f32
    %175 = vector.broadcast %cst_62 : f32 to vector<16x1xf32>
    %176 = arith.divf %174, %175 : vector<16x1xf32>
    %cst_63 = arith.constant 9.99999996E-13 : f32
    %177 = vector.broadcast %cst_63 : f32 to vector<16x1xf32>
    %178 = arith.addf %176, %177 : vector<16x1xf32>
    %179 = math.rsqrt %178 : vector<16x1xf32>
    %180 = vector.broadcast %179 : vector<16x1xf32> to vector<16x128xf32>
    %181 = arith.mulf %171, %180 : vector<16x128xf32>
    %182 = vector.broadcast %11 : vector<1x128xf32> to vector<16x128xf32>
    %183 = arith.mulf %181, %182 : vector<16x128xf32>
    %184 = vector.broadcast %12 : vector<1x128xf32> to vector<16x128xf32>
    %185 = arith.addf %183, %184 : vector<16x128xf32>
    %c0_64 = arith.constant 0 : index
    %c0_65 = arith.constant 0 : index
    %186 = vector.load %arg12[%c0_64, %c0_65] : memref<16x128xf32, #tpu.memory_space<vmem>>, vector<16x128xf32>
    tpu.vector_store %arg12[%c0_64, %c0_65], %185 {strides = array<i32>} : memref<16x128xf32, #tpu.memory_space<vmem>>, vector<16x128xf32>,
    %c1_i32 = arith.constant 1 : i32
    %187 = arith.cmpi eq, %arg1, %c1_i32 : i32
    %188 = arith.extui %187 : i1 to i32
    %c0_i32_66 = arith.constant 0 : i32
    %189 = arith.cmpi ne, %188, %c0_i32_66 : i32
    scf.if %189 {
      %190 = vector.extract_strided_slice %185 {offsets = [0, 0], sizes = [1, 128], strides = [1, 1]} : vector<16x128xf32> to vector<1x128xf32>
      %191 = arith.truncf %190 : vector<1x128xf32> to vector<1x128xbf16>
      %c0_67 = arith.constant 0 : index
      %c0_68 = arith.constant 0 : index
      %192 = vector.load %arg9[%c0_67, %c0_68] : memref<128x128xbf16, #tpu.memory_space<vmem>>, vector<128x128xbf16>
      %cst_69 = arith.constant dense<0.000000e+00> : vector<1x128xf32>
      %193 = tpu.matmul %191, %192, %cst_69 {dimension_numbers = #tpu.dot_dimension_numbers<[1], [0], [0], [1], [0, 0, 1, 1], [], []>} : vector<1x128xbf16>, vector<128x128xbf16>, vector<1x128xf32> -> vector<1x128xf32>
      %c0_70 = arith.constant 0 : index
      %c0_71 = arith.constant 0 : index
      %194 = vector.load %arg10[%c0_70, %c0_71] : memref<1x128xf32, #tpu.memory_space<vmem>>, vector<1x128xf32>
      %195 = arith.addf %193, %194 : vector<1x128xf32>
      %196 = math.tanh %195 : vector<1x128xf32>
      %c0_72 = arith.constant 0 : index
      %c0_73 = arith.constant 0 : index
      %c0_74 = arith.constant 0 : index
      %197 = vector.load %arg11[%c0_72, %c0_73, %c0_74] : memref<1x1x128xf32, #tpu.memory_space<vmem>>, vector<1x1x128xf32>
      %198 = vector.shape_cast %197 : vector<1x1x128xf32> to vector<1x128xf32>
      %199 = vector.shape_cast %196 : vector<1x128xf32> to vector<1x1x128xf32>
      tpu.vector_store %arg11[%c0_72, %c0_73, %c0_74], %199 {strides = array<i32>} : memref<1x1x128xf32, #tpu.memory_space<vmem>>, vector<1x1x128xf32>,
    } else {
    }
    return
  }
  func.func @transform_1(%arg0: i32, %arg1: i32) -> (i32, i32, i32) {
    %c0_i32 = arith.constant 0 : i32
    %c0_i32_0 = arith.constant 0 : i32
    %c0_i32_1 = arith.constant 0 : i32
    return %arg0, %c0_i32, %c0_i32_0 : i32, i32, i32
  }
  func.func @transform_2(%arg0: i32, %arg1: i32) -> (i32, i32, i32) {
    %c0_i32 = arith.constant 0 : i32
    %c0_i32_0 = arith.constant 0 : i32
    %c0_i32_1 = arith.constant 0 : i32
    return %arg1, %c0_i32, %c0_i32_0 : i32, i32, i32
  }
  func.func @transform_3(%arg0: i32, %arg1: i32) -> (i32, i32, i32) {
    %c0_i32 = arith.constant 0 : i32
    %c0_i32_0 = arith.constant 0 : i32
    %c0_i32_1 = arith.constant 0 : i32
    return %arg1, %c0_i32, %c0_i32_0 : i32, i32, i32
  }
  func.func @transform_4(%arg0: i32, %arg1: i32) -> (i32, i32, i32) {
    %c0_i32 = arith.constant 0 : i32
    %c0_i32_0 = arith.constant 0 : i32
    %c0_i32_1 = arith.constant 0 : i32
    return %arg1, %c0_i32, %c0_i32_0 : i32, i32, i32
  }
  func.func @transform_5(%arg0: i32, %arg1: i32) -> (i32, i32, i32) {
    %c0_i32 = arith.constant 0 : i32
    %c0_i32_0 = arith.constant 0 : i32
    %c0_i32_1 = arith.constant 0 : i32
    return %arg1, %c0_i32, %c0_i32_0 : i32, i32, i32
  }
  func.func @transform_6(%arg0: i32, %arg1: i32) -> (i32, i32, i32) {
    %c0_i32 = arith.constant 0 : i32
    %c0_i32_0 = arith.constant 0 : i32
    %c0_i32_1 = arith.constant 0 : i32
    return %arg1, %c0_i32, %c0_i32_0 : i32, i32, i32
  }
  func.func @transform_7(%arg0: i32, %arg1: i32) -> (i32, i32) {
    %c0_i32 = arith.constant 0 : i32
    %c0_i32_0 = arith.constant 0 : i32
    %c0_i32_1 = arith.constant 0 : i32
    return %c0_i32, %c0_i32_0 : i32, i32
  }
  func.func @transform_8(%arg0: i32, %arg1: i32) -> (i32, i32) {
    %c0_i32 = arith.constant 0 : i32
    %c0_i32_0 = arith.constant 0 : i32
    %c0_i32_1 = arith.constant 0 : i32
    return %c0_i32, %c0_i32_0 : i32, i32
  }
  func.func @transform_9(%arg0: i32, %arg1: i32) -> (i32, i32, i32) {
    %c0_i32 = arith.constant 0 : i32
    %c0_i32_0 = arith.constant 0 : i32
    %c0_i32_1 = arith.constant 0 : i32
    return %arg0, %c0_i32, %c0_i32_0 : i32, i32, i32
  }
}

</mosaic_0001>

<bundles_post_ra>
// kernel: flash_bert_forward.1
= control target key start
LH: loop header
LB: loop body
LE: loop exit
PB: predicated region body
PF: predicated region fallthrough
CT: control target
= control target key end

     0   :  { %s3936_s0 = inlined_call_operand.vmem [shape: f32[2,16,128], index: 0, kind: input, shape index: {}]   ;;  %s3937_s1 = inlined_call_operand.vmem [shape: f32[2,1,16], index: 1, kind: input, shape index: {}]   ;;  %s3938_s2 = inlined_call_operand.hbm [shape: bf16[2,128,384], index: 2, kind: input, shape index: {}]   ;;  %s3939_s3 = inlined_call_operand.hbm [shape: bf16[2,128,128], index: 3, kind: input, shape index: {}]   ;;  %s3940_s4 = inlined_call_operand.vmem [shape: bf16[2,128,512], index: 4, kind: input, shape index: {}]   ;;  %s3941_s5 = inlined_call_operand.vmem [shape: bf16[2,512,128], index: 5, kind: input, shape index: {}]   ;;  %s3942_s6 = inlined_call_operand.hbm [shape: f32[2,8,512], index: 6, kind: input, shape index: {}]   ;;  %s3943_s7 = inlined_call_operand.vmem [shape: bf16[128,128], index: 7, kind: input, shape index: {}]   ;;  %s3944_s8 = inlined_call_operand.vmem [shape: f32[1,128], index: 8, kind: input, shape index: {}]   ;;  %s3945_s9 = inlined_call_operand.vmem [shape: f32[2,1,128], index: 9, kind: output, shape index: {}]  }
   0x1   :  { %3952 = sst [smem:[#allocation19_spill]] %s3938_s2 }
   0x2   :  { %3953 = sst [smem:[#allocation20_spill]] %s3939_s3 }
   0x3   :  { %3954 = sst [smem:[#allocation21_spill]] %s3944_s8 }
   0x4   :  { %14 = vsyncpa [#allocation6], 0 }
   0x5   :  { %16 = vsyncpa [#allocation6 + $0x1], 0 }
   0x6   :  { %17 = vsyncpa [#allocation8], 0 }
   0x7   :  { %19 = vsyncpa [#allocation8 + $0x1], 0  ;;  %s3346_s30 = smov 0   ;;  %s3348_s10 = smov 0  }
   0x8   :  { %s3350_s11 = smov 0   ;;  %s3352_s12 = smov 0  }
   0x9   :  { %s3354_s13 = smov 0   ;;  %s3356_s14 = smov 0  }
   0xa   :  { %s3358_s15 = smov 0   ;;  %s3360_s16 = smov 0  }
   0xb LB: > { %3955 = sst [smem:[#allocation14_spill]] %s3259_s11  ;;  %s3946_s17 = sadd.s32 4294967295, %s3279_s16   ;;  %s3279_s16 = sphi %s3360_s16, %s25_s16   ;;  %s3275_s15 = sphi %s3358_s15, %s3981_s15   ;;  %s3271_s14 = sphi %s3356_s14, %s3980_s14   ;;  %s3267_s13 = sphi %s3354_s13, %s3974_s13   ;;  %s3263_s12 = sphi %s3352_s12, %s3979_s12   ;;  %s3259_s11 = sphi %s3350_s11, %s3973_s11   ;;  %s3255_s10 = sphi %s3348_s10, %s3978_s10   ;;  %s3251_s30 = sphi %s3346_s30, %s3977_s30  }
   0xc   : > { %3956 = sst [smem:[#allocation15_spill]] %s3275_s15  ;;  %s34_s18 = sadd.s32 1, %s3271_s14 }
   0xd   : > { %p35_p0 = scmp.ge.s32.totalorder %s34_s18, 2  ;;  %s37_s19 = sadd.s32 1, %s3275_s15 }
   0xe   : > { %s70_s20 = sadd.s32 1, %s3259_s11  ;;  %p77_p1 = scmp.ne.s32.totalorder %s3259_s11, %s3255_s10 }
   0xf   : > { %s3983_s18 = smov (%p35_p0, %s34_s18), 0  ;;  %s3985_s19 = smov (!%p35_p0, %s37_s19), %s3275_s15 }
  0x10   : > { %3957 = sst [smem:[#allocation16_spill]] %s3983_s18  ;;  %s67_s21 = ssub.s32 %s3271_s14, %s3983_s18 }
  0x11   : > { %p78_p2 = scmp.eq.s32.totalorder %s3279_s16, 0  ;;  %p39_p3 = scmp.ge.s32.totalorder %s3985_s19, 2 }
  0x12   : > { %p68_p4 = scmp.eq.s32.totalorder %s67_s21, 0  ;;  %p83_p6 = scmp.ne.s32.totalorder %s3255_s10, %s3251_s30 }
  0x13   : > { %p79_p5 = por %p78_p2, %p77_p1  ;;  %s3987_s19 = smov (%p39_p3, %s3985_s19), 0 }
  0x14   : > { %3958 = sst [smem:[#allocation17_spill]] %s3987_s19  ;;  %p84_p7 = scmp.eq.s32.totalorder %s3946_s17, 0 }
  0x15   : > { %s3400_s22 = scalar_select %p68_p4, %s3259_s11, %s70_s20  }
  0x16   : > { %p2853_p8 = scmp.lt.s32.totalorder %s3279_s16, 4  ;;  %s3406_s23 = sand.u32 1, %s3259_s11  }
  0x17   : > { %3959 = sst [smem:[#allocation18_spill]] %s3400_s22  ;;  %p3408_p9 = por %p84_p7, %p83_p6 }
  0x18   : > { %s312_s25 = sand.u32 1, %s3279_s16   ;;  %p3413_p10 = pnand %p2853_p8, %p79_p5 }
  0x19   : > { %s3960_s24 = scalar_select %p3408_p9, 1, 0 }
  0x1a   : > { %s3961_s26 = scalar_select %p3413_p10, 1, 0 }
  0x1b   : > { %s2503_s27 = sshll.u32 %s3406_s23, 6  ;;  %s2635_s28 = sshll.u32 %s3271_s14, 10 }
  0x1c   : > { %s3962_s3 = sld [smem:[#allocation20_spill]]  ;;  %s316_s21 = scalar_lea.vmem [#allocation7], %s2503_s27 }
  0x1d   : > { %s323_s17 = sshll.u32 %s316_s21, 4  ;;  %s3427_s19 = scalar_lea.sflag [#allocation8], %s312_s25  ;;  %s3424_s17 = int_to_ptr.vmem [resolvable:$true] %s323_s17 }
  0x1e   : > { %p3433_p13 = pneg %p3413_p10 }
  0x22   : > { %s3422_s20 = scalar_lea.hbm %s3962_s3, %s2635_s28  ;;  %s3122_s27 = scalar_lea.hbm %s3962_s3, 2048 }
  0x23   : > { %s3117_s18 = scalar_lea.hbm %s3422_s20, 1024  ;;  %p3123_p2 = scmp.lt.u32.totalorder %s3422_s20, %s3962_s3 }
  0x24   : > { %p3118_p12 = scmp.ne.s32.totalorder %s3422_s20, %s3117_s18  ;;  %p3124_p3 = scmp.lt.u32.totalorder %s3122_s27, %s3117_s18 }
  0x25   : > { %p3126_p5 = scmp.lt.u32.totalorder %s3117_s18, %s3422_s20 }
  0x26   : > { %p3120_p0 = pnand %p3433_p13, %p3118_p12  ;;  %p3125_p4 = por %p3124_p3, %p3123_p2 }
  0x28   : > { %p3121_p1 = pneg %p3120_p0  ;;  %p3127_p6 = por %p3126_p5, %p3125_p4 }
  0x2a   : > { %p3128_p7 = pnand %p3127_p6, %p3121_p1 }
  0x2c   : > { %3131 = shalt.err (!%p3128_p7)
}
  0x2d   : > { %s3132_s25 = scalar_lea.vmem %s3424_s17, 1024  ;;  %s3281_s28 = smov [#allocation7]  }
  0x2e   : > { %p3133_p8 = scmp.ne.s32.totalorder %s3424_s17, %s3132_s25  ;;  %s3137_s29 = sshll.u32 %s3281_s28, 4  ;;  %s3138_s29 = int_to_ptr.vmem [resolvable:$false] %s3137_s29 }
  0x2f   : > { %s3139_s30 = scalar_lea.vmem %s3138_s29, 2048  ;;  %p3140_p11 = scmp.lt.s32.totalorder %s3424_s17, %s3138_s29 }
  0x30   : > { %p3135_p12 = pnand %p3133_p8, %p3433_p13  ;;  %p3141_p9 = scmp.lt.s32.totalorder %s3139_s30, %s3132_s25 }
  0x32   : > { %p3136_p0 = pneg %p3135_p12  ;;  %p3142_p2 = por %p3141_p9, %p3140_p11 }
  0x34   : > { %p3143_p3 = pnand %p3142_p2, %p3136_p0 }
  0x36   : > { %3146 = shalt.err (!%p3143_p3)
}
  0x37   : > { %s3282_s18 = smov 64   ;;  %s3283_s27 = smov 4  }
  0x38   : > { %2849 = dma.hbm_to_vmem [thread:$0]  (!%p3413_p10), %s3422_s20, 1024, %s3424_s17, %s3427_s19, %s3282_s18, %s3282_s18, %s3283_s27  }
  0x39   : > { %p366_p1 = scmp.lt.s32.totalorder %s3279_s16, 5  ;;  %p3964_p4 = scmp.ge.s32.totalorder %s3279_s16, 1 }
  0x3a   : > { %s2834_s25 = smul.u32 192, %s3406_s23  ;;  %s3966_s2 = sld [smem:[#allocation19_spill]] }
  0x3b   : > { %p3460_p9 = pnand %p3964_p4, %p366_p1  ;;  %s2835_s28 = smul.u32 3072, %s3271_s14 }
  0x3c   : > { %s295_s22 = scalar_lea.vmem [#allocation5], %s2834_s25  ;;  %s2506_s17 = sshll.u32 %s3406_s23, 5 }
  0x3d   : > { %s3965_s21 = scalar_select %p3460_p9, 1, 0 }
  0x3e   : > { %s302_s11 = sshll.u32 %s295_s22, 4  ;;  %s292_s20 = scalar_lea.sflag [#allocation6], %s3406_s23  ;;  %s3471_s11 = int_to_ptr.vmem [resolvable:$true] %s302_s11 }
  0x40   : > { %s3469_s3 = scalar_lea.hbm %s3966_s2, %s2835_s28  ;;  %s3152_s28 = scalar_lea.hbm %s3966_s2, 6144 }
  0x41   : > { %s3147_s18 = scalar_lea.hbm %s3469_s3, 3072  ;;  %p3153_p7 = scmp.lt.u32.totalorder %s3469_s3, %s3966_s2 }
  0x42   : > { %p3148_p11 = scmp.ne.s32.totalorder %s3469_s3, %s3147_s18  ;;  %p3154_p8 = scmp.lt.u32.totalorder %s3152_s28, %s3147_s18 }
  0x43   : > { %p3156_p0 = scmp.lt.u32.totalorder %s3147_s18, %s3469_s3 }
  0x44   : > { %p3150_p5 = pnand %p3148_p11, %p3433_p13  ;;  %p3155_p12 = por %p3154_p8, %p3153_p7 }
  0x46   : > { %p3151_p6 = pneg %p3150_p5  ;;  %p3157_p2 = por %p3156_p0, %p3155_p12 }
  0x48   : > { %p3158_p3 = pnand %p3157_p2, %p3151_p6 }
  0x4a   : > { %3161 = shalt.err (!%p3158_p3)
}
  0x4b   : > { %s3162_s22 = scalar_lea.vmem %s3471_s11, 3072  ;;  %s3284_s8 = smov [#allocation5]  }
  0x4c   : > { %p3163_p1 = scmp.ne.s32.totalorder %s3471_s11, %s3162_s22  ;;  %s3167_s25 = sshll.u32 %s3284_s8, 4  ;;  %s3168_s25 = int_to_ptr.vmem [resolvable:$false] %s3167_s25 }
  0x4d   : > { %s3169_s27 = scalar_lea.vmem %s3168_s25, 6144  ;;  %p3170_p5 = scmp.lt.s32.totalorder %s3471_s11, %s3168_s25 }
  0x4e   : > { %p3165_p4 = pnand %p3163_p1, %p3433_p13  ;;  %p3171_p9 = scmp.lt.s32.totalorder %s3169_s27, %s3162_s22 }
  0x50   : > { %p3166_p11 = pneg %p3165_p4  ;;  %p3172_p7 = por %p3171_p9, %p3170_p5 }
  0x52   : > { %p3173_p8 = pnand %p3172_p7, %p3166_p11 }
  0x54   : > { %3176 = shalt.err (!%p3173_p8)
}
  0x55   : > { %s3285_s18 = smov 192   ;;  %s3286_s28 = smov 12  }
  0x56   : > { %2846 = dma.hbm_to_vmem [thread:$0]  (!%p3413_p10), %s3469_s3, 3072, %s3471_s11, %s292_s20, %s3285_s18, %s3285_s18, %s3286_s28  }
  0x57   : > { %s2636_s29 = sshll.u32 %s3271_s14, 9  ;;  %s353_s25 = scalar_lea.vmem [#allocation9], %s2506_s17 }
  0x58   : > { %s3502_s22 = scalar_lea.hbm %s3942_s6, %s2636_s29  ;;  %s361_s27 = sshll.u32 %s353_s25, 4  ;;  %s362_s27 = int_to_ptr.vmem [resolvable:$true] %s361_s27 }
  0x59   : > { %s3177_s2 = scalar_lea.hbm %s3502_s22, 512  ;;  %s3182_s20 = scalar_lea.hbm %s3942_s6, 1024 }
  0x5a   : > { %p3178_p9 = scmp.ne.s32.totalorder %s3502_s22, %s3177_s2  ;;  %p3183_p0 = scmp.lt.u32.totalorder %s3502_s22, %s3942_s6 }
  0x5b   : > { %p3184_p2 = scmp.lt.u32.totalorder %s3182_s20, %s3177_s2  ;;  %p3186_p1 = scmp.lt.u32.totalorder %s3177_s2, %s3502_s22 }
  0x5c   : > { %p3180_p6 = pnand %p3178_p9, %p3433_p13 }
  0x5d   : > { %p3185_p3 = por %p3184_p2, %p3183_p0 }
  0x5e   : > { %p3181_p12 = pneg %p3180_p6 }
  0x5f   : > { %p3187_p4 = por %p3186_p1, %p3185_p3 }
  0x61   : > { %p3188_p11 = pnand %p3187_p4, %p3181_p12 }
  0x63   : > { %3191 = shalt.err (!%p3188_p11)
}
  0x64   : > { %s3192_s23 = scalar_lea.vmem %s362_s27, 512  ;;  %s3287_s17 = smov [#allocation9]  }
  0x65   : > { %p3193_p5 = scmp.ne.s32.totalorder %s362_s27, %s3192_s23  ;;  %s3197_s29 = sshll.u32 %s3287_s17, 4  ;;  %s3198_s29 = int_to_ptr.vmem [resolvable:$false] %s3197_s29 }
  0x66   : > { %s3199_s30 = scalar_lea.vmem %s3198_s29, 1024  ;;  %p3200_p9 = scmp.lt.s32.totalorder %s362_s27, %s3198_s29 }
  0x67   : > { %p3195_p7 = pnand %p3193_p5, %p3433_p13  ;;  %p3201_p6 = scmp.lt.s32.totalorder %s3199_s30, %s3192_s23 }
  0x69   : > { %p3196_p8 = pneg %p3195_p7  ;;  %p3202_p10 = por %p3201_p6, %p3200_p9 }
  0x6b   : > { %p3203_p0 = pnand %p3202_p10, %p3196_p8 }
  0x6d   : > { %3206 = shalt.err (!%p3203_p0)
}
  0x6e   : > { %p3967_p2 = scmp.ne.s32.totalorder %s3961_s26, 0  ;;  %p3968_p12 = scmp.ne.s32.totalorder %s3965_s21, 0 }
  0x6f   : > { %s372_s2 = sand.u32 (!%p3968_p12), 1, %s3255_s10   ;;  %p3969_p13 = scmp.ne.s32.totalorder (!%p3968_p12), %s3960_s24, 0 }
  0x70   : > { %2852 = dma.hbm_to_vmem [thread:$0]  (!%p3967_p2), %s3502_s22, 512, %s362_s27, %s3427_s19  }
  0x71   : > { %370 = sbr.rel (%p3968_p12) target bundleno = 3391 (0xd3f), region = 52  ;;  %s373_s8 = scalar_lea.sflag (!%p3968_p12), [#allocation6], %s372_s2 }
  0x72   : > { %s2836_s15 = smul.u32 (!%p3968_p12), 192, %s372_s2 }
  0x74   : > { %s3527_s25 = scalar_lea.vmem (!%p3968_p12), [#allocation5], %s2836_s15 }
  0x78   : > { %3240 = dma.done.wait (%p3969_p13), %s373_s8, 3072  }
  0x79   : > { %3242 = vsyncadd (%p3969_p13), %s373_s8, 4294964224  ;;  %s3970_s26 = sadd.s32 4294967295, %s3279_s16   ;;  %s2510_s19 = sshll.u32 %s372_s2, 6 }
  0x7a   : > { %s381_s3 = sand.u32 1, %s3970_s26   ;;  %s3535_s21 = scalar_lea.vmem [#allocation7], %s2510_s19 }
  0x7b   : > { %s382_s22 = scalar_lea.sflag [#allocation8], %s381_s3 }
  0x7c   : > { %3244 = dma.done.wait (%p3969_p13), %s382_s22, 1536  }
  0x7d   : > { %3246 = vsyncadd (%p3969_p13), %s382_s22, 4294965760  ;;  %s2511_s27 = sshll.u32 %s372_s2, 5  ;;  %p448_p10 = scmp.lt.s32.totalorder %s3267_s13, 1 }
  0x7e   : > { %p451_p3 = scmp.lt.s32.totalorder %s3263_s12, 1  ;;  %s3565_s22 = scalar_lea.vmem [#allocation9], %s2511_s27 }
  0x7f   : > { %s3544_s11 = scalar_select %p448_p10, %s3267_s13, 1 }
  0x80   : > { %s452_s20 = scalar_select %p451_p3, %s3263_s12, 1 }
  0x81   : > { %s450_s23 = scalar_lea.vmem %s3937_s1, %s3544_s11  ;;  %s463_s24 = scalar_lea.vmem %s3945_s9, %s3544_s11 }
  0x82   : > { %s2637_s30 = sshll.u32 %s452_s20, 8  ;;  %p2516_p1 = scmp.ne.s32.totalorder %s3263_s12, 0 }
  0x83   : > { %s3558_s2 = scalar_lea.vmem %s3940_s4, %s2637_s30  ;;  %s3563_s19 = scalar_lea.vmem %s3941_s5, %s2637_s30 }
  0x84   : > { %468 = sbr.rel (%p2516_p1) target bundleno = 142 (0x8e), region = 68  ;;  %s2517_s18 = sshll.u32 (!%p2516_p1), %s3267_s13, 4 }
  0x85   : > { %s470_s20 = scalar_lea.vmem (!%p2516_p1), %s3936_s0, %s2517_s18 }
  0x86   : > { %v503_v0 = vld [vmem:[%s470_s20] sm:$0xff] (!%p2516_p1)  ;;  %v505_v1 = vld [vmem:[%s470_s20 + $0x8] sm:$0xff] (!%p2516_p1) }
  0x87   : > { %504 = vst [vmem:[#allocation2] sm:$0xff] (!%p2516_p1), %v503_v0  ;;  %506 = vst [vmem:[#allocation2 + $0x8] sm:$0xff] (!%p2516_p1), %v505_v1 }
  0x8b   : > { %514 = vsyncadd [#allocation4], 256 }
  0x8c   : > { %3247 = dma.done.wait [#allocation4], 256 }
  0x8d   : > { %3248 = vsyncadd [#allocation4], 4294967040 }
  0x8e PF: > { %v2930_v2 = vld [vmem:[%s3527_s25 + $0x4] ss:$12 sps:$4 sm:$0xff]   ;;  %v2932_v3 = vld [vmem:[%s3527_s25] ss:$12 sps:$4 sm:$0xff]   ;;  %v3288_v4 = vmov 0   ;;  %v3289_v5 = vmov 0.0   ;;  %v557_v31 = vlaneseq }
  0x8f   : > { %729 = vmatprep.mubr.bf16.mxu0 %v3288_v4  ;;  %2726 = vmatprep.subr.bf16.mxu1 %v3289_v5  ;;  %v2933_v6 = vld [vmem:[%s3527_s25 + $0x1c] ss:$12 sps:$4 sm:$0xff]   ;;  %v2935_v7 = vld [vmem:[%s3527_s25 + $0x18] ss:$12 sps:$4 sm:$0xff]   ;;  %v2936_v8 = vld [vmem:[%s3527_s25 + $0x34] ss:$12 sps:$4 sm:$0xff]  }
  0x90   : > { %697 = vmatprep.subr.bf16.mxu0 %v2930_v2  ;;  %v2938_v9 = vld [vmem:[%s3527_s25 + $0x30] ss:$12 sps:$4 sm:$0xff]   ;;  %v2939_v10 = vld [vmem:[%s3527_s25 + $0x4c] ss:$12 sps:$4 sm:$0xff]   ;;  %v2941_v11 = vld [vmem:[%s3527_s25 + $0x48] ss:$12 sps:$4 sm:$0xff]  }
  0x91   : > { %698 = vmatpush1.bf16.msra.mxu0 %v2932_v3  ;;  %v2942_v12 = vld [vmem:[%s3527_s25 + $0x64] ss:$12 sps:$4 sm:$0xff]   ;;  %v2954_v13 = vld [vmem:[%s3527_s25 + $0x8] ss:$12 sps:$4 sm:$0xff]   ;;  %v2955_v14 = vld [vmem:[%s3527_s25 + $0x20] ss:$12 sps:$4 sm:$0xff]  }
  0x92   : > { %699 = vmatprep.subr.bf16.mxu0 %v2933_v6  ;;  %2727 = vmatpush3.bf16.msra.mxu1 %v2954_v13  ;;  %v2944_v15 = vld [vmem:[%s3527_s25 + $0x60] ss:$12 sps:$4 sm:$0xff]   ;;  %v2945_v16 = vld [vmem:[%s3527_s25 + $0x7c] ss:$12 sps:$4 sm:$0xff]   ;;  %v2947_v17 = vld [vmem:[%s3527_s25 + $0x78] ss:$12 sps:$4 sm:$0xff]  }
  0x93   : > { %2728 = vmatprep.subr.bf16.mxu1 %v3289_v5  ;;  %v2948_v18 = vld [vmem:[%s3527_s25 + $0x94] ss:$12 sps:$4 sm:$0xff]   ;;  %v2956_v19 = vld [vmem:[%s3527_s25 + $0x38] ss:$12 sps:$4 sm:$0xff]   ;;  %v2957_v20 = vld [vmem:[%s3527_s25 + $0x50] ss:$12 sps:$4 sm:$0xff]  }
  0x94   : > { %v2950_v21 = vld [vmem:[%s3527_s25 + $0x90] ss:$12 sps:$4 sm:$0xff]   ;;  %v2951_v22 = vld [vmem:[%s3527_s25 + $0xac] ss:$12 sps:$4 sm:$0xff]   ;;  %v2958_v23 = vld [vmem:[%s3527_s25 + $0x68] ss:$12 sps:$4 sm:$0xff]  }
  0x95   : > { %700 = vmatpush1.bf16.msra.mxu0 %v2935_v7  ;;  %v2953_v24 = vld [vmem:[%s3527_s25 + $0xa8] ss:$12 sps:$4 sm:$0xff]   ;;  %v3598_v25 = vld [vmem:[#allocation2] sm:$0xff]  ;;  %v2961_v30 = vld [vmem:[%s3527_s25 + $0xb0] ss:$12 sps:$4 sm:$0xff]   ;;  %vm3290_vm0 = vmmov 0  }
  0x96   : > { %701 = vmatprep.subr.bf16.mxu0 %v2936_v8  ;;  %2729 = vmatpush3.bf16.msra.mxu1 %v2955_v14  ;;  %v3600_v26 = vld [vmem:[#allocation2 + $0x8] sm:$0xff]  ;;  %v2960_v29 = vld [vmem:[%s3527_s25 + $0x98] ss:$12 sps:$4 sm:$0xff]   ;;  %v3619_v32 = vshrl.u32 %v557_v31, 7  ;;  %vm785_vm1 = vcmask 261120   ;;  %v3636_v49 = vld [vmem:[%s3565_s22 + $0x10] sm:$0xff] }
  0x97   : > { %2730 = vmatprep.subr.bf16.mxu1 %v3289_v5  ;;  %v2959_v27 = vld [vmem:[%s3527_s25 + $0x80] ss:$12 sps:$4 sm:$0xff]   ;;  %v524_v28 = vpack.c.bf16 %v3600_v26, %v3598_v25  ;;  %2742 = vmatprep.mubr.msk.bf16.mxu1 %vm3290_vm0, %v3289_v5  ;;  %vm843_vm2 = vcmask 130048   ;;  %s3291_s27 = smov 96   ;;  %s3293_s29 = smov 64   ;;  %vm1049_vm3 = vcmask 523520  }
  0x98   : > { %v559_v33 = vsub.s32 0, %v3619_v32  ;;  %v3623_v34 = vld [vmem:[%s3565_s22] sm:$0xff]  ;;  %v3626_v35 = vld [vmem:[%s3565_s22 + $0x8] sm:$0xff]  ;;  %vm1185_vm4 = vcmask 785920   ;;  %vm1321_vm5 = vcmask 1048320   ;;  %p2623_p4 = scmp.ne.s32.totalorder %s3263_s12, 1 }
  0x99   : > { %702 = vmatpush1.bf16.msra.mxu0 %v2938_v9  ;;  %v3648_v59 = vld [vmem:[%s450_s23] ss:$0 sm:$0xff]  ;;  %s3292_s23 = smov 32   ;;  %vm3295_vm6 = vmmov (!%p2623_p4), 0  }
  0x9a   : > { %703 = vmatprep.subr.bf16.mxu0 %v2939_v10  ;;  %2731 = vmatpush3.bf16.msra.mxu1 %v2956_v19  ;;  %v560_v36 = vrot.slane %v3623_v34, %v559_v33  ;;  %v564_v38 = vrot.slane %v3626_v35, %v559_v33  ;;  %v568_v50 = vrot.slane %v3636_v49, %v559_v33 }
  0x9b   : > { %2732 = vmatprep.subr.bf16.mxu1 %v3289_v5 }
  0x9d   : > { %704 = vmatpush1.bf16.msra.mxu0 %v2941_v11 }
  0x9e   : > { %705 = vmatprep.subr.bf16.mxu0 %v2942_v12  ;;  %2733 = vmatpush3.bf16.msra.mxu1 %v2957_v20 }
  0x9f   : > { %2734 = vmatprep.subr.bf16.mxu1 %v3289_v5 }
  0xa1   : > { %706 = vmatpush1.bf16.msra.mxu0 %v2944_v15 }
  0xa2   : > { %707 = vmatprep.subr.bf16.mxu0 %v2945_v16  ;;  %2735 = vmatpush3.bf16.msra.mxu1 %v2958_v23 }
  0xa3   : > { %2736 = vmatprep.subr.bf16.mxu1 %v3289_v5 }
  0xa5   : > { %708 = vmatpush1.bf16.msra.mxu0 %v2947_v17 }
  0xa6   : > { %709 = vmatprep.subr.bf16.mxu0 %v2948_v18  ;;  %2737 = vmatpush3.bf16.msra.mxu1 %v2959_v27 }
  0xa7   : > { %2738 = vmatprep.subr.bf16.mxu1 %v3289_v5 }
  0xa9   : > { %710 = vmatpush1.bf16.msra.mxu0 %v2950_v21 }
  0xaa   : > { %711 = vmatprep.subr.bf16.mxu0 %v2951_v22  ;;  %2739 = vmatpush3.bf16.msra.mxu1 %v2960_v29 }
  0xab   : > { %2740 = vmatprep.subr.bf16.mxu1 %v3289_v5 }
  0xad   : > { %712 = vmatpush1.bf16.msra.mxu0 %v2953_v24 }
  0xae   : > { %2770 = vmatprep.subr.bf16.mxu0 %v3289_v5  ;;  %2741 = vmatpush3.bf16.msra.mxu1 %v2961_v30 }
  0xaf   : > { %2746 = vmatprep.subr.bf16.mxu1 %v3289_v5 }
  0xb0   : > { %730 = vmatmul.mubr.bf16.vlgmr.msra.gmra.mrb[0].mxu0 %v524_v28 }
  0xb1   : > { %2772 = vmatprep.mubr.msk.bf16.mxu0 %vm3290_vm0, %v3289_v5  ;;  %2743 = vmatmul.mubr.bf16.vlgmr.msra.gmra.mrb[0].mxu1 %v524_v28 }
  0xb2   : > { %2748 = vmatprep.mubr.msk.bf16.mxu1 %vm3290_vm0, %v3289_v5 }
 0x183   : > { %v731_v37 = vpop.f32.mrb[0].mxu0 }
 0x184   : > { %v733_v39 = vpop.f32.mrb[1].mxu0  ;;  %v732_v41 = vadd.f32 %v731_v37, %v560_v36  ;;  %v774_v51 = vpop.f32.mrb[0].mxu1 }
 0x185   : > { %v735_v40 = vpop.f32.mrb[2].mxu0  ;;  %v734_v44 = vadd.f32 %v733_v39, %v564_v38  ;;  %v775_v52 = vadd.f32 %v774_v51, %v568_v50  ;;  %v2744_v53 = vpop.f32.mrb[1].mxu1 }
 0x186   : > { %v736_v42 = vadd.f32 %v735_v40, %v560_v36  ;;  %v737_v43 = vpop.f32.mrb[3].mxu0  ;;  %v777_v54 = vpop.f32.mrb[2].mxu1 }
 0x187   : > { %v738_v45 = vadd.f32 %v737_v43, %v564_v38  ;;  %v778_v55 = vadd.f32 %v777_v54, %v568_v50  ;;  %v2745_v56 = vpop.f32.mrb[3].mxu1 }
 0x188   : > { %v782_v46 = vpack.c.bf16 %v736_v42, %v732_v41 }
 0x189   : > { %v783_v47 = vpack.c.bf16 %v738_v45, %v734_v44  ;;  %v3639_v57 = vpack.c.bf16 %v778_v55, %v775_v52 }
 0x18b   : > { %v790_v48 = vsel %vm785_vm1, %v783_v47, 0 }
 0x18c   : > { %2747 = vmatpush3.bf16.xpose.msra.mxu1 %v790_v48 }
 0x18d   : > { %2752 = vmatprep.subr.bf16.mxu1 %v3289_v5 }
 0x193   : > { %2749 = vmatmul.mubr.msk.bf16.vlgmr.msra.gmra.mrb[4].mxu1 %vm785_vm1, %v782_v46 }
 0x194   : > { %2754 = vmatprep.mubr.msk.bf16.mxu1 %vm3290_vm0, %v3289_v5  ;;  %2753 = vmatpush3.bf16.msra.mxu1 %v3639_v57 }
 0x195   : > { %2758 = vmatprep.subr.bf16.mxu1 %v3289_v5 }
 0x266   : > { %v826_v58 = vpop.f32.mrb[4].mxu1 }
 0x267   : > { %v833_v60 = vmul.f32 0.17677669, %v826_v58  ;;  %v2750_v61 = vpop.f32.mrb[5].mxu1 }
 0x268   : > { %v829_v62 = vpop.f32.mrb[6].mxu1 }
 0x269   : > { %v834_v63 = vmul.f32 0.17677669, %v829_v62  ;;  %v2751_v0 = vpop.f32.mrb[7].mxu1  ;;  %v841_v1 = vadd.f32 %v3648_v59, %v833_v60 }
 0x26b   : > { %v844_v2 = vsel %vm843_vm2, %v841_v1, -inf  ;;  %v842_v3 = vadd.f32 %v3648_v59, %v834_v63 }
 0x26c   : > { %845 = vmax.xlane.f32.xlu0 %v844_v2 }
 0x26d   : > { %v847_v6 = vsel %vm843_vm2, %v842_v3, -inf }
 0x270   : > { %848 = vmax.xlane.f32.xlu0 %v847_v6 }
 0x286   : > { %917 = vrot.lane.b32.xlu0 %v783_v47, %s3291_s27 }
 0x28a   : > { %1190 = vrot.lane.b32.xlu0 %v783_v47, %s3292_s23 }
 0x2f9   : > { %v846_v7 = vpop.xlane.xlu0 %845 }
 0x2fa   : > { %v850_v8 = vsub.f32 %v841_v1, %v846_v7 }
 0x2fc   : > { %v852_v9 = vmul.f32 1.442695, %v850_v8 }
 0x2fd   : > { %v849_v10 = vpop.xlane.xlu0 %848 }
 0x2fe   : > { %3050 = vpow2.f32 %v852_v9  ;;  %v851_v11 = vsub.f32 %v842_v3, %v849_v10 }
 0x300   : > { %v854_v12 = vmul.f32 1.442695, %v851_v11 }
 0x301   : > { %v918_v20 = vpop.permute.xlu0 %917 }
 0x302   : > { %3052 = vpow2.f32 %v854_v12  ;;  %v923_v31 = vsel %vm785_vm1, %v918_v20, 0 }
 0x305   : > { %v1191_v29 = vpop.permute.xlu0 %1190 }
 0x306   : > { %v1196_v36 = vsel %vm785_vm1, %v1191_v29, 0 }
 0x308   : > { %v3051_v13 = vpop.eup %3050 }
 0x309   : > { %v856_v14 = vsel %vm843_vm2, %v3051_v13, 0.0 }
 0x30a   : > { %857 = vadd.xlane.f32.xlu1 %v856_v14 }
 0x30c   : > { %v3053_v15 = vpop.eup %3052 }
 0x30d   : > { %v859_v16 = vsel %vm843_vm2, %v3053_v15, 0.0 }
 0x30e   : > { %860 = vadd.xlane.f32.xlu1 %v859_v16 }
 0x31f   : > { %914 = vrot.lane.b32.xlu1 %v782_v46, %s3291_s27 }
 0x323   : > { %1054 = vrot.lane.b32.xlu1 %v783_v47, %s3293_s29 }
 0x327   : > { %1052 = vrot.lane.b32.xlu1 %v782_v46, %s3293_s29 }
 0x32b   : > { %1188 = vrot.lane.b32.xlu1 %v782_v46, %s3292_s23 }
 0x397   : > { %v858_v17 = vpop.xlane.xlu1 %857 }
 0x398   : > { %3054 = vrcp.f32 %v858_v17 }
 0x39b   : > { %v861_v18 = vpop.xlane.xlu1 %860 }
 0x39c   : > { %3056 = vrcp.f32 %v861_v18 }
 0x39f   : > { %v915_v19 = vpop.permute.xlu1 %914 }
 0x3a2   : > { %v3055_v22 = vpop.eup %3054 }
 0x3a3   : > { %v1055_v21 = vpop.permute.xlu1 %1054  ;;  %v864_v27 = vmul.f32 %v3055_v22, %v3051_v13 }
 0x3a4   : > { %v1060_v23 = vsel %vm785_vm1, %v1055_v21, 0 }
 0x3a5   : > { %2771 = vmatpush3.bf16.xpose.msra.mxu0 %v1060_v23 }
 0x3a6   : > { %v3057_v24 = vpop.eup %3056  ;;  %2782 = vmatprep.subr.bf16.mxu0 %v3289_v5 }
 0x3a7   : > { %v865_v28 = vmul.f32 %v3057_v24, %v3053_v15  ;;  %v1053_v33 = vpop.permute.xlu1 %1052 }
 0x3a9   : > { %v866_v30 = vpack.c.bf16 %v865_v28, %v864_v27 }
 0x3ab   : > { %2755 = vmatmul.mubr.msk.bf16.vlgmr.msra.gmra.mrb[8].mxu1 %vm843_vm2, %v866_v30  ;;  %v1189_v37 = vpop.permute.xlu1 %1188 }
 0x3ac   : > { %2759 = vmatpush3.bf16.xpose.msra.mxu1 %v923_v31  ;;  %2773 = vmatmul.mubr.msk.bf16.vlgmr.msra.gmra.mrb[4].mxu0 %vm785_vm1, %v1053_v33 }
 0x3ad   : > { %2783 = vmatpush3.bf16.xpose.msra.mxu0 %v1196_v36  ;;  %2760 = vmatprep.mubr.msk.bf16.mxu1 %vm3290_vm0, %v3289_v5 }
 0x3ae   : > { %2784 = vmatprep.mubr.msk.bf16.mxu0 %vm3290_vm0, %v3289_v5  ;;  %2764 = vmatprep.subr.bf16.mxu1 %v3289_v5 }
 0x3af   : > { %2794 = vmatprep.subr.bf16.mxu0 %v3289_v5 }
 0x3b3   : > { %2761 = vmatmul.mubr.msk.bf16.vlgmr.msra.gmra.mrb[12].mxu1 %vm785_vm1, %v915_v19 }
 0x3b4   : > { %2785 = vmatmul.mubr.msk.bf16.vlgmr.msra.gmra.mrb[8].mxu0 %vm785_vm1, %v1189_v37  ;;  %2766 = vmatprep.mubr.msk.bf16.mxu1 %vm3290_vm0, %v3289_v5 }
 0x3b5   : > { %2810 = vmatprep.mubr.msk.bf16.mxu0 %vm3290_vm0, %v3289_v5 }
 0x47e   : > { %v904_v38 = vpop.f32.mrb[8].mxu1 }
 0x47f   : > { %911 = vst.msk [vmem:[#allocation3] sm:$0xff] %vm785_vm1, %v904_v38  ;;  %v2756_v39 = vpop.f32.mrb[9].mxu1  ;;  %v1096_v40 = vpop.f32.mrb[4].mxu0 }
 0x480   : > { %v907_v41 = vpop.f32.mrb[10].mxu1  ;;  %v2774_v42 = vpop.f32.mrb[5].mxu0  ;;  %v1103_v47 = vmul.f32 0.17677669, %v1096_v40 }
 0x481   : > { %912 = vst.msk [vmem:[#allocation3 + $0x8] sm:$0xff] %vm785_vm1, %v907_v41  ;;  %v2757_v43 = vpop.f32.mrb[11].mxu1  ;;  %v1099_v44 = vpop.f32.mrb[6].mxu0 }
 0x482   : > { %v2775_v45 = vpop.f32.mrb[7].mxu0  ;;  %v1104_v62 = vmul.f32 0.17677669, %v1099_v44  ;;  %v1105_v1 = vadd.f32 %v3648_v59, %v1103_v47 }
 0x484   : > { %v1107_v7 = vsel %vm843_vm2, %v1105_v1, -inf  ;;  %v1106_v8 = vadd.f32 %v3648_v59, %v1104_v62 }
 0x486   : > { %v959_v46 = vpop.f32.mrb[12].mxu1  ;;  %v1110_v10 = vsel %vm843_vm2, %v1106_v8, -inf }
 0x487   : > { %v966_v48 = vmul.f32 0.17677669, %v959_v46  ;;  %v2762_v50 = vpop.f32.mrb[13].mxu1  ;;  %v1232_v51 = vpop.f32.mrb[8].mxu0 }
 0x488   : > { %v962_v52 = vpop.f32.mrb[14].mxu1  ;;  %v2786_v53 = vpop.f32.mrb[9].mxu0  ;;  %v1239_v6 = vmul.f32 0.17677669, %v1232_v51 }
 0x489   : > { %v967_v54 = vmul.f32 0.17677669, %v962_v52  ;;  %v2763_v55 = vpop.f32.mrb[15].mxu1  ;;  %v1235_v56 = vpop.f32.mrb[10].mxu0  ;;  %v968_v58 = vadd.f32 %v3648_v59, %v966_v48 }
 0x48a   : > { %v1240_v60 = vmul.f32 0.17677669, %v1235_v56  ;;  %v2787_v61 = vpop.f32.mrb[11].mxu0  ;;  %v1241_v11 = vadd.f32 %v3648_v59, %v1239_v6 }
 0x48b   : > { %v970_v63 = vsel %vm843_vm2, %v968_v58, -inf  ;;  %v969_v0 = vadd.f32 %v3648_v59, %v967_v54 }
 0x48c   : > { %971 = vmax.xlane.f32.xlu0 %v970_v63  ;;  %v1242_v3 = vadd.f32 %v3648_v59, %v1240_v60  ;;  %v1243_v12 = vsel %vm843_vm2, %v1241_v11, -inf }
 0x48d   : > { %v973_v2 = vsel %vm843_vm2, %v969_v0, -inf }
 0x48e   : > { %974 = vmax.xlane.f32.xlu1 %v973_v2  ;;  %v1246_v9 = vsel %vm843_vm2, %v1242_v3, -inf }
 0x490   : > { %1108 = vmax.xlane.f32.xlu0 %v1107_v7 }
 0x492   : > { %1247 = vmax.xlane.f32.xlu1 %v1246_v9 }
 0x494   : > { %1111 = vmax.xlane.f32.xlu0 %v1110_v10 }
 0x498   : > { %1244 = vmax.xlane.f32.xlu0 %v1243_v12  ;;  %v2963_v12 = vld [vmem:[%s3535_s21 + $0x8] sm:$0xff]  }
 0x519   : > { %v972_v13 = vpop.xlane.xlu0 %971 }
 0x51a   : > { %v976_v22 = vsub.f32 %v968_v58, %v972_v13  ;;  %v2964_v13 = vld [vmem:[%s3535_s21 + $0x10] sm:$0xff]  }
 0x51b   : > { %v975_v14 = vpop.xlane.xlu1 %974 }
 0x51c   : > { %v977_v23 = vsub.f32 %v969_v0, %v975_v14  ;;  %v978_v29 = vmul.f32 1.442695, %v976_v22  ;;  %v2965_v14 = vld [vmem:[%s3535_s21 + $0x18] sm:$0xff]  }
 0x51d   : > { %v1109_v15 = vpop.xlane.xlu0 %1108 }
 0x51e   : > { %v1113_v16 = vsub.f32 %v1105_v1, %v1109_v15  ;;  %v980_v30 = vmul.f32 1.442695, %v977_v23  ;;  %v2966_v15 = vld [vmem:[%s3535_s21 + $0x20] sm:$0xff]  }
 0x51f   : > { %v1248_v17 = vpop.xlane.xlu1 %1247 }
 0x520   : > { %v1115_v18 = vmul.f32 1.442695, %v1113_v16  ;;  %v1250_v19 = vsub.f32 %v1242_v3, %v1248_v17 }
 0x521   : > { %v1112_v20 = vpop.xlane.xlu0 %1111 }
 0x522   : > { %3058 = vpow2.f32 %v1115_v18  ;;  %v1114_v21 = vsub.f32 %v1106_v8, %v1112_v20  ;;  %v1253_v24 = vmul.f32 1.442695, %v1250_v19  ;;  %v2967_v20 = vld [vmem:[%s3535_s21 + $0x28] sm:$0xff]  }
 0x524   : > { %v1117_v27 = vmul.f32 1.442695, %v1114_v21  ;;  %v2968_v21 = vld [vmem:[%s3535_s21 + $0x30] sm:$0xff]  }
 0x525   : > { %v1245_v28 = vpop.xlane.xlu0 %1244 }
 0x526   : > { %3060 = vpow2.f32 %v1117_v27  ;;  %v1249_v59 = vsub.f32 %v1241_v11, %v1245_v28  ;;  %v2962_v11 = vld [vmem:[%s3535_s21] sm:$0xff]   ;;  %v2969_v27 = vld [vmem:[%s3535_s21 + $0x38] sm:$0xff]  }
 0x527   : > { %3062 = vpow2.f32 %v1253_v24  ;;  %2795 = vmatpush3.bf16.msra.mxu0 %v2962_v11  ;;  %v2993_v11 = vld [vmem:[%s3558_s2 + $0x6c] ss:$16 sps:$4 sm:$0xff]  }
 0x528   : > { %v1251_v31 = vmul.f32 1.442695, %v1249_v59  ;;  %2796 = vmatprep.subr.bf16.mxu0 %v3289_v5 }
 0x52a   : > { %3064 = vpow2.f32 %v1251_v31 }
 0x52b   : > { %3066 = vpow2.f32 %v978_v29  ;;  %2797 = vmatpush3.bf16.msra.mxu0 %v2963_v12  ;;  %v2988_v12 = vld [vmem:[%s3558_s2 + $0x60] ss:$16 sps:$4 sm:$0xff]  }
 0x52c   : > { %v3059_v33 = vpop.eup %3058  ;;  %3068 = vpow2.f32 %v980_v30  ;;  %2798 = vmatprep.subr.bf16.mxu0 %v3289_v5 }
 0x52d   : > { %v1119_v36 = vsel %vm843_vm2, %v3059_v33, 0.0 }
 0x52e   : > { %1120 = vadd.xlane.f32.xlu0 %v1119_v36 }
 0x52f   : > { %2799 = vmatpush3.bf16.msra.mxu0 %v2964_v13  ;;  %v2991_v13 = vld [vmem:[%s3558_s2 + $0x68] ss:$16 sps:$4 sm:$0xff]  }
 0x530   : > { %v3061_v37 = vpop.eup %3060  ;;  %2800 = vmatprep.subr.bf16.mxu0 %v3289_v5 }
 0x531   : > { %v1122_v38 = vsel %vm843_vm2, %v3061_v37, 0.0  ;;  %v3063_v39 = vpop.eup %3062 }
 0x532   : > { %1123 = vadd.xlane.f32.xlu1 %v1122_v38  ;;  %v1258_v43 = vsel %vm843_vm2, %v3063_v39, 0.0 }
 0x533   : > { %2801 = vmatpush3.bf16.msra.mxu0 %v2965_v14  ;;  %v2996_v14 = vld [vmem:[%s3558_s2 + $0x84] ss:$16 sps:$4 sm:$0xff]  }
 0x534   : > { %v3065_v40 = vpop.eup %3064  ;;  %2802 = vmatprep.subr.bf16.mxu0 %v3289_v5 }
 0x535   : > { %v3067_v41 = vpop.eup %3066  ;;  %v1255_v42 = vsel %vm843_vm2, %v3065_v40, 0.0 }
 0x536   : > { %v3069_v44 = vpop.eup %3068  ;;  %1256 = vadd.xlane.f32.xlu0 %v1255_v42  ;;  %1259 = vadd.xlane.f32.xlu1 %v1258_v43  ;;  %v982_v45 = vsel %vm843_vm2, %v3067_v41, 0.0  ;;  %v1345_v43 = vsub.s32 1, %v3619_v32 }
 0x537   : > { %v985_v46 = vsel %vm843_vm2, %v3069_v44, 0.0  ;;  %2803 = vmatpush3.bf16.msra.mxu0 %v2966_v15  ;;  %v2999_v15 = vld [vmem:[%s3558_s2 + $0x8c] ss:$16 sps:$4 sm:$0xff]  }
 0x538   : > { %2804 = vmatprep.subr.bf16.mxu0 %v3289_v5 }
 0x53a   : > { %983 = vadd.xlane.f32.xlu0 %v982_v45  ;;  %986 = vadd.xlane.f32.xlu1 %v985_v46 }
 0x53b   : > { %2805 = vmatpush3.bf16.msra.mxu0 %v2967_v20  ;;  %v3000_v20 = vld [vmem:[%s3558_s2 + $0xa0] ss:$16 sps:$4 sm:$0xff]  }
 0x53c   : > { %2806 = vmatprep.subr.bf16.mxu0 %v3289_v5 }
 0x53f   : > { %2807 = vmatpush3.bf16.msra.mxu0 %v2968_v21  ;;  %v3003_v21 = vld [vmem:[%s3558_s2 + $0xa8] ss:$16 sps:$4 sm:$0xff]  }
 0x540   : > { %2808 = vmatprep.subr.bf16.mxu0 %v3289_v5 }
 0x543   : > { %2809 = vmatpush3.bf16.msra.mxu0 %v2969_v27  ;;  %v3009_v27 = vld [vmem:[%s3558_s2 + $0xc8] ss:$16 sps:$4 sm:$0xff]  }
 0x54b   : > { %1130 = vrot.lane.b32.xlu1 %v3639_v57, %s3293_s29 }
 0x54f   : > { %1266 = vrot.lane.b32.xlu1 %v3639_v57, %s3292_s23 }
 0x550   : > { %994 = vrot.lane.b32.xlu0 %v3639_v57, %s3291_s27 }
 0x5bb   : > { %v1121_v47 = vpop.xlane.xlu0 %1120 }
 0x5bf   : > { %v1124_v48 = vpop.xlane.xlu1 %1123 }
 0x5c3   : > { %v1257_v50 = vpop.xlane.xlu0 %1256  ;;  %v1260_v51 = vpop.xlane.xlu1 %1259 }
 0x5c7   : > { %v984_v52 = vpop.xlane.xlu0 %983  ;;  %v987_v53 = vpop.xlane.xlu1 %986 }
 0x5c8   : > { %3070 = vrcp.f32 %v984_v52 }
 0x5c9   : > { %3072 = vrcp.f32 %v987_v53  ;;  %v2970_v53 = vld [vmem:[%s3558_s2] ss:$16 sps:$4 sm:$0xff]  }
 0x5ca   : > { %3074 = vrcp.f32 %v1124_v48 }
 0x5cb   : > { %v995_v54 = vpop.permute.xlu0 %994  ;;  %3076 = vrcp.f32 %v1121_v47  ;;  %v1131_v62 = vpop.permute.xlu1 %1130 }
 0x5cc   : > { %2765 = vmatpush3.bf16.msra.mxu1 %v995_v54  ;;  %3078 = vrcp.f32 %v1257_v50  ;;  %v2972_v54 = vld [vmem:[%s3558_s2 + $0x4] ss:$16 sps:$4 sm:$0xff]  }
 0x5cd   : > { %2776 = vmatprep.subr.bf16.mxu1 %v3289_v5  ;;  %3080 = vrcp.f32 %v1260_v51 }
 0x5cf   : > { %v1267_v7 = vpop.permute.xlu1 %1266 }
 0x5d2   : > { %v3071_v55 = vpop.eup %3070 }
 0x5d3   : > { %v3073_v56 = vpop.eup %3072  ;;  %v990_v58 = vmul.f32 %v3071_v55, %v3067_v41  ;;  %v2973_v55 = vld [vmem:[%s3558_s2 + $0x8] ss:$16 sps:$4 sm:$0xff]  }
 0x5d4   : > { %v991_v60 = vmul.f32 %v3073_v56, %v3069_v44  ;;  %v3075_v61 = vpop.eup %3074  ;;  %v1346_v44 = vrot.slane %v3623_v34, %v1345_v43  ;;  %v2975_v56 = vld [vmem:[%s3558_s2 + $0xc] ss:$16 sps:$4 sm:$0xff]   ;;  %v1469_v43 = vsub.s32 3, %v3619_v32 }
 0x5d5   : > { %v3077_v63 = vpop.eup %3076  ;;  %v1128_v0 = vmul.f32 %v3075_v61, %v3061_v37  ;;  %1725 = vmatprep.subr.bf16.mxu0 %v2975_v56  ;;  %v3022_v56 = vld [vmem:[%s3563_s19 + $0x48] sm:$0xff]  }
 0x5d6   : > { %v992_v57 = vpack.c.bf16 %v991_v60, %v990_v58  ;;  %v1127_v1 = vmul.f32 %v3077_v63, %v3059_v33  ;;  %v3079_v2 = vpop.eup %3078  ;;  %v2978_v58 = vld [vmem:[%s3558_s2 + $0x24] ss:$16 sps:$4 sm:$0xff]   ;;  %v2981_v60 = vld [vmem:[%s3558_s2 + $0x2c] ss:$16 sps:$4 sm:$0xff]  }
 0x5d7   : > { %v3081_v6 = vpop.eup %3080  ;;  %v1263_v8 = vmul.f32 %v3079_v2, %v3065_v40 }
 0x5d8   : > { %2767 = vmatmul.mubr.msk.bf16.vlgmr.msra.gmra.mrb[16].mxu1 %vm843_vm2, %v992_v57  ;;  %v1129_v3 = vpack.c.bf16 %v1128_v0, %v1127_v1  ;;  %v1264_v9 = vmul.f32 %v3081_v6, %v3063_v39  ;;  %v2976_v57 = vld [vmem:[%s3558_s2 + $0x20] ss:$16 sps:$4 sm:$0xff]   ;;  %v2984_v6 = vld [vmem:[%s3558_s2 + $0x44] ss:$16 sps:$4 sm:$0xff]  }
 0x5d9   : > { %2777 = vmatpush3.bf16.msra.mxu1 %v1131_v62  ;;  %2778 = vmatprep.mubr.msk.bf16.mxu1 %vm3290_vm0, %v3289_v5 }
 0x5da   : > { %2788 = vmatprep.subr.bf16.mxu1 %v3289_v5  ;;  %v1265_v10 = vpack.c.bf16 %v1264_v9, %v1263_v8  ;;  %v2982_v8 = vld [vmem:[%s3558_s2 + $0x40] ss:$16 sps:$4 sm:$0xff]   ;;  %v2985_v9 = vld [vmem:[%s3558_s2 + $0x48] ss:$16 sps:$4 sm:$0xff]  }
 0x5e0   : > { %2779 = vmatmul.mubr.msk.bf16.vlgmr.msra.gmra.mrb[20].mxu1 %vm843_vm2, %v1129_v3 }
 0x5e1   : > { %2789 = vmatpush3.bf16.msra.mxu1 %v1267_v7  ;;  %2790 = vmatprep.mubr.msk.bf16.mxu1 %vm3290_vm0, %v3289_v5  ;;  %v2987_v7 = vld [vmem:[%s3558_s2 + $0x4c] ss:$16 sps:$4 sm:$0xff]  }
 0x5e2   : > { %1682 = vmatprep.subr.bf16.mxu1 %v2972_v54  ;;  %v3020_v54 = vld [vmem:[%s3563_s19] sm:$0xff]  }
 0x5e8   : > { %2791 = vmatmul.mubr.msk.bf16.vlgmr.msra.gmra.mrb[24].mxu1 %vm843_vm2, %v1265_v10  ;;  %v2990_v10 = vld [vmem:[%s3558_s2 + $0x64] ss:$16 sps:$4 sm:$0xff]  }
 0x5e9   : > { %1714 = vmatprep.mubr.bf16.mxu1 %v3288_v4  ;;  %1683 = vmatpush1.bf16.msra.mxu1 %v2970_v53  ;;  %v3019_v53 = vld [vmem:[%s3563_s19 + $0xc0] sm:$0xff]  }
 0x5ea   : > { %1684 = vmatprep.subr.bf16.mxu1 %v2978_v58  ;;  %v3023_v58 = vld [vmem:[%s3563_s19 + $0xc8] sm:$0xff]  }
 0x5ed   : > { %1685 = vmatpush1.bf16.msra.mxu1 %v2976_v57  ;;  %v3025_v57 = vld [vmem:[%s3563_s19 + $0x88] sm:$0xff]  }
 0x5ee   : > { %1686 = vmatprep.subr.bf16.mxu1 %v2984_v6  ;;  %v3035_v6 = vld [vmem:[%s3563_s19 + $0xe0] sm:$0xff]  }
 0x5f1   : > { %1687 = vmatpush1.bf16.msra.mxu1 %v2982_v8  ;;  %v3037_v8 = vld [vmem:[%s3563_s19 + $0xa0] sm:$0xff]  }
 0x5f2   : > { %1688 = vmatprep.subr.bf16.mxu1 %v2990_v10  ;;  %v3039_v10 = vld [vmem:[%s3563_s19 + $0xe8] sm:$0xff]  }
 0x5f5   : > { %1689 = vmatpush1.bf16.msra.mxu1 %v2988_v12  ;;  %v3041_v12 = vld [vmem:[%s3563_s19 + $0xa8] sm:$0xff]  }
 0x5f6   : > { %1690 = vmatprep.subr.bf16.mxu1 %v2996_v14  ;;  %v3043_v14 = vld [vmem:[%s3563_s19 + $0xf0] sm:$0xff]  }
 0x6ab   : > { %v1034_v16 = vpop.f32.mrb[16].mxu1 }
 0x6ac   : > { %1043 = vrot.lane.b32.xlu1 %v1034_v16, %s3292_s23  ;;  %v2768_v17 = vpop.f32.mrb[17].mxu1  ;;  %v2994_v16 = vld [vmem:[%s3558_s2 + $0x80] ss:$16 sps:$4 sm:$0xff]  }
 0x6ad   : > { %v1037_v18 = vpop.f32.mrb[18].mxu1  ;;  %v2997_v17 = vld [vmem:[%s3558_s2 + $0x88] ss:$16 sps:$4 sm:$0xff]   ;;  %1691 = vmatpush1.bf16.msra.mxu1 %v2994_v16  ;;  %v3045_v16 = vld [vmem:[%s3563_s19 + $0xb0] sm:$0xff]  }
 0x6ae   : > { %1045 = vrot.lane.b32.xlu0 %v1037_v18, %s3292_s23  ;;  %v2769_v19 = vpop.f32.mrb[19].mxu1  ;;  %v3002_v18 = vld [vmem:[%s3558_s2 + $0xa4] ss:$16 sps:$4 sm:$0xff]  }
 0x6af   : > { %v3005_v19 = vld [vmem:[%s3558_s2 + $0xac] ss:$16 sps:$4 sm:$0xff]   ;;  %1692 = vmatprep.subr.bf16.mxu1 %v3002_v18 }
 0x6b0   : > { %v3047_v18 = vld [vmem:[%s3563_s19 + $0xf8] sm:$0xff]  }
 0x6b1   : > { %1693 = vmatpush1.bf16.msra.mxu1 %v3000_v20  ;;  %v3049_v20 = vld [vmem:[%s3563_s19 + $0xb8] sm:$0xff]  }
 0x6b3   : > { %v1170_v22 = vpop.f32.mrb[20].mxu1 }
 0x6b4   : > { %1179 = vrot.lane.b32.xlu1 %v1170_v22, %s3293_s29  ;;  %v2780_v23 = vpop.f32.mrb[21].mxu1  ;;  %v3008_v22 = vld [vmem:[%s3558_s2 + $0xc4] ss:$16 sps:$4 sm:$0xff]  }
 0x6b5   : > { %v1173_v24 = vpop.f32.mrb[22].mxu1  ;;  %v3011_v23 = vld [vmem:[%s3558_s2 + $0xcc] ss:$16 sps:$4 sm:$0xff]   ;;  %1694 = vmatprep.subr.bf16.mxu1 %v3008_v22 }
 0x6b6   : > { %1181 = vrot.lane.b32.xlu0 %v1173_v24, %s3293_s29  ;;  %v2781_v28 = vpop.f32.mrb[23].mxu1  ;;  %v3006_v24 = vld [vmem:[%s3558_s2 + $0xc0] ss:$16 sps:$4 sm:$0xff]   ;;  %v521_v22 = vld [vmem:[%s3565_s22 + $0x18] sm:$0xff]  ;;  %s3971_s29 = sld [smem:[#allocation21_spill]] (!%p2623_p4) }
 0x6b7   : > { %v3014_v28 = vld [vmem:[%s3558_s2 + $0xe4] ss:$16 sps:$4 sm:$0xff]   ;;  %1695 = vmatpush1.bf16.msra.mxu1 %v3006_v24 }
 0x6b8   : > { %1696 = vmatprep.subr.bf16.mxu1 %v3014_v28 }
 0x6bb   : > { %v1306_v59 = vpop.f32.mrb[24].mxu1 }
 0x6bc   : > { %1315 = vrot.lane.b32.xlu1 %v1306_v59, %s3291_s27  ;;  %v2792_v29 = vpop.f32.mrb[25].mxu1  ;;  %v3017_v59 = vld [vmem:[%s3558_s2 + $0xec] ss:$16 sps:$4 sm:$0xff]  }
 0x6bd   : > { %v1309_v30 = vpop.f32.mrb[26].mxu1  ;;  %v3012_v29 = vld [vmem:[%s3558_s2 + $0xe0] ss:$16 sps:$4 sm:$0xff]  }
 0x6be   : > { %1317 = vrot.lane.b32.xlu0 %v1309_v30, %s3291_s27  ;;  %v2793_v31 = vpop.f32.mrb[27].mxu1  ;;  %v3015_v30 = vld [vmem:[%s3558_s2 + $0xe8] ss:$16 sps:$4 sm:$0xff]   ;;  %1697 = vmatpush1.bf16.msra.mxu1 %v3012_v29 }
 0x71e   : > { %v1044_v33 = vpop.permute.xlu1 %1043 }
 0x71f   : > { %1050 = vst.msk [vmem:[#allocation3] sm:$0xff] %vm1049_vm3, %v1044_v33 }
 0x720   : > { %v1046_v36 = vpop.permute.xlu0 %1045 }
 0x721   : > { %1051 = vst.msk [vmem:[#allocation3 + $0x8] sm:$0xff] %vm1049_vm3, %v1046_v36 }
 0x726   : > { %v1180_v37 = vpop.permute.xlu1 %1179 }
 0x727   : > { %1186 = vst.msk [vmem:[#allocation3] sm:$0xff] %vm1185_vm4, %v1180_v37 }
 0x728   : > { %v1182_v38 = vpop.permute.xlu0 %1181 }
 0x729   : > { %1187 = vst.msk [vmem:[#allocation3 + $0x8] sm:$0xff] %vm1185_vm4, %v1182_v38 }
 0x72e   : > { %v1316_v5 = vpop.permute.xlu1 %1315 }
 0x72f   : > { %1322 = vst.msk [vmem:[#allocation3] sm:$0xff] %vm1321_vm5, %v1316_v5 }
 0x730   : > { %v1318_v39 = vpop.permute.xlu0 %1317 }
 0x731   : > { %1323 = vst.msk [vmem:[#allocation3 + $0x8] sm:$0xff] %vm1321_vm5, %v1318_v39  ;;  %v1463_v39 = vsub.s32 2, %v3619_v32 }
 0x736   : > { %v1324_v40 = vld [vmem:[#allocation3] sm:$0xff] }
 0x738   : > { %v1325_v41 = vld [vmem:[#allocation3 + $0x8] sm:$0xff] }
 0x739   : > { %v1326_v42 = vpack.c.bf16 %v1325_v41, %v1324_v40 }
 0x73b   : > { %2811 = vmatmul.mubr.bf16.vlgmr.msra.gmra.mrb[12].mxu0 %v1326_v42  ;;  %v1464_v42 = vrot.slane %v3623_v34, %v1463_v39 }
 0x73c   : > { %1757 = vmatprep.mubr.bf16.mxu0 %v3288_v4  ;;  %1726 = vmatpush1.bf16.msra.mxu0 %v2973_v55  ;;  %v3021_v55 = vld [vmem:[%s3563_s19 + $0x80] sm:$0xff]  }
 0x73d   : > { %1727 = vmatprep.subr.bf16.mxu0 %v2981_v60  ;;  %v3024_v60 = vld [vmem:[%s3563_s19 + $0x8] sm:$0xff]  }
 0x80e   : > { %v1429_v45 = vpop.f32.mrb[12].mxu0 }
 0x80f   : > { %v1430_v46 = vadd.f32 %v1429_v45, %v1346_v44  ;;  %v2812_v47 = vpop.f32.mrb[13].mxu0 }
 0x810   : > { %v1432_v48 = vpop.f32.mrb[14].mxu0  ;;  %v1470_v47 = vrot.slane %v3623_v34, %v1469_v43 }
 0x811   : > { %v1433_v50 = vadd.f32 %v1432_v48, %v1346_v44  ;;  %v2813_v51 = vpop.f32.mrb[15].mxu0  ;;  %v1436_v52 = vadd.f32 %v1430_v46, %v3598_v25  ;;  %v2979_v25 = vld [vmem:[%s3558_s2 + $0x28] ss:$16 sps:$4 sm:$0xff]  }
 0x812   : > { %1728 = vmatpush1.bf16.msra.mxu0 %v2979_v25  ;;  %v3026_v25 = vld [vmem:[%s3563_s19 + $0x50] sm:$0xff]  }
 0x813   : > { %1438 = vadd.xlane.f32.xlu1 %v1436_v52  ;;  %v1437_v4 = vadd.f32 %v1433_v50, %v3600_v26  ;;  %1729 = vmatprep.subr.bf16.mxu0 %v2987_v7  ;;  %v3036_v7 = vld [vmem:[%s3563_s19 + $0x20] sm:$0xff]  }
 0x815   : > { %1440 = vadd.xlane.f32.xlu0 %v1437_v4 }
 0x816   : > { %1730 = vmatpush1.bf16.msra.mxu0 %v2985_v9  ;;  %v3038_v9 = vld [vmem:[%s3563_s19 + $0x68] sm:$0xff]  }
 0x817   : > { %1731 = vmatprep.subr.bf16.mxu0 %v2993_v11  ;;  %v3040_v11 = vld [vmem:[%s3563_s19 + $0x28] sm:$0xff]  }
 0x81a   : > { %1732 = vmatpush1.bf16.msra.mxu0 %v2991_v13  ;;  %v3042_v13 = vld [vmem:[%s3563_s19 + $0x70] sm:$0xff]  }
 0x81b   : > { %1733 = vmatprep.subr.bf16.mxu0 %v2999_v15  ;;  %v3044_v15 = vld [vmem:[%s3563_s19 + $0x30] sm:$0xff]  }
 0x81e   : > { %1734 = vmatpush1.bf16.msra.mxu0 %v2997_v17  ;;  %v3046_v17 = vld [vmem:[%s3563_s19 + $0x78] sm:$0xff]  }
 0x81f   : > { %1735 = vmatprep.subr.bf16.mxu0 %v3005_v19  ;;  %v3048_v19 = vld [vmem:[%s3563_s19 + $0x38] sm:$0xff]  }
 0x822   : > { %1736 = vmatpush1.bf16.msra.mxu0 %v3003_v21  ;;  %v1508_v21 = vsub.s32 4, %v3619_v32 }
 0x823   : > { %1737 = vmatprep.subr.bf16.mxu0 %v3011_v23 }
 0x824   : > { %v1509_v23 = vrot.slane %v3623_v34, %v1508_v21  ;;  %v1517_v24 = vrot.slane %v3636_v49, %v1508_v21  ;;  %v1521_v28 = vrot.slane %v521_v22, %v1508_v21 }
 0x826   : > { %1738 = vmatpush1.bf16.msra.mxu0 %v3009_v27  ;;  %v1513_v27 = vrot.slane %v3626_v35, %v1508_v21 }
 0x827   : > { %1739 = vmatprep.subr.bf16.mxu0 %v3017_v59 }
 0x82a   : > { %1740 = vmatpush1.bf16.msra.mxu0 %v3015_v30 }
 0x82b   : > { %2695 = vmatprep.subr.bf16.mxu0 %v3019_v53 }
 0x8a0   : > { %v1439_v26 = vpop.xlane.xlu1 %1438 }
 0x8a1   : > { %v1443_v61 = vmul.f32 0.0078125, %v1439_v26  ;;  %v3027_v26 = vld [vmem:[%s3563_s19 + $0xd0] sm:$0xff]  }
 0x8a2   : > { %v1441_v62 = vpop.xlane.xlu0 %1440 }
 0x8a3   : > { %v3750_v63 = vsub.f32 %v1436_v52, %v1443_v61  ;;  %v1444_v0 = vmul.f32 0.0078125, %v1441_v62  ;;  %v3028_v61 = vld [vmem:[%s3563_s19 + $0x10] sm:$0xff]  }
 0x8a4   : > { %v3029_v62 = vld [vmem:[%s3563_s19 + $0x90] sm:$0xff]  }
 0x8a5   : > { %v3752_v1 = vsub.f32 %v1437_v4, %v1444_v0  ;;  %v1447_v2 = vmul.f32 %v3750_v63, %v3750_v63  ;;  %v3018_v4 = vld [vmem:[%s3563_s19 + $0x40] sm:$0xff]   ;;  %v3031_v0 = vld [vmem:[%s3563_s19 + $0xd8] sm:$0xff]  }
 0x8a6   : > { %2673 = vmatprep.subr.bf16.mxu1 %v3018_v4 }
 0x8a7   : > { %1449 = vadd.xlane.f32.xlu0 %v1447_v2  ;;  %v1448_v3 = vmul.f32 %v3752_v1, %v3752_v1  ;;  %v3033_v2 = vld [vmem:[%s3563_s19 + $0x98] sm:$0xff]  }
 0x8ab   : > { %1451 = vadd.xlane.f32.xlu0 %v1448_v3  ;;  %v3034_v3 = vld [vmem:[%s3563_s19 + $0x60] sm:$0xff]  }
 0x934   : > { %v1450_v31 = vpop.xlane.xlu0 %1449 }
 0x935   : > { %v1453_v33 = vmul.f32 0.0078125, %v1450_v31 }
 0x937   : > { %v1455_v36 = vadd.f32 1e-12, %v1453_v33 }
 0x938   : > { %v1452_v37 = vpop.xlane.xlu0 %1451 }
 0x939   : > { %3082 = vrsqrt.f32 %v1455_v36  ;;  %v1454_v38 = vmul.f32 0.0078125, %v1452_v37 }
 0x93b   : > { %v1456_v5 = vadd.f32 1e-12, %v1454_v38 }
 0x93d   : > { %3084 = vrsqrt.f32 %v1456_v5 }
 0x943   : > { %v3083_v40 = vpop.eup %3082 }
 0x944   : > { %v1459_v41 = vmul.f32 %v3083_v40, %v3750_v63  ;;  %v3030_v63 = vld [vmem:[%s3563_s19 + $0x58] sm:$0xff]  }
 0x946   : > { %v1465_v46 = vmul.f32 %v1464_v42, %v1459_v41 }
 0x947   : > { %v3085_v44 = vpop.eup %3084 }
 0x948   : > { %v1460_v45 = vmul.f32 %v3085_v44, %v3752_v1  ;;  %v3788_v50 = vadd.f32 %v1470_v47, %v1465_v46  ;;  %v3032_v1 = vld [vmem:[%s3563_s19 + $0x18] sm:$0xff]  }
 0x94a   : > { %v1466_v48 = vmul.f32 %v1464_v42, %v1460_v45 }
 0x94c   : > { %v3790_v51 = vadd.f32 %v1470_v47, %v1466_v48 }
 0x94e   : > { %v1473_v52 = vpack.c.bf16 %v3790_v51, %v3788_v50 }
 0x950   : > { %1715 = vmatmul.mubr.bf16.vlgmr.msra.gmra.mrb[28].mxu1 %v1473_v52  ;;  %1758 = vmatmul.mubr.bf16.vlgmr.msra.gmra.mrb[16].mxu0 %v1473_v52 }
 0x951   : > { %2674 = vmatpush3.bf16.msra.mxu1 %v3020_v54  ;;  %2696 = vmatpush3.bf16.msra.mxu0 %v3021_v55 }
 0x952   : > { %2675 = vmatprep.subr.bf16.mxu1 %v3022_v56  ;;  %2697 = vmatprep.subr.bf16.mxu0 %v3023_v58 }
 0x955   : > { %2676 = vmatpush3.bf16.msra.mxu1 %v3024_v60  ;;  %2698 = vmatpush3.bf16.msra.mxu0 %v3025_v57 }
 0x956   : > { %2677 = vmatprep.subr.bf16.mxu1 %v3026_v25  ;;  %2699 = vmatprep.subr.bf16.mxu0 %v3027_v26 }
 0x959   : > { %2678 = vmatpush3.bf16.msra.mxu1 %v3028_v61  ;;  %2700 = vmatpush3.bf16.msra.mxu0 %v3029_v62 }
 0x95a   : > { %2679 = vmatprep.subr.bf16.mxu1 %v3030_v63  ;;  %2701 = vmatprep.subr.bf16.mxu0 %v3031_v0 }
 0x95d   : > { %2680 = vmatpush3.bf16.msra.mxu1 %v3032_v1  ;;  %2702 = vmatpush3.bf16.msra.mxu0 %v3033_v2 }
 0x95e   : > { %2681 = vmatprep.subr.bf16.mxu1 %v3034_v3  ;;  %2703 = vmatprep.subr.bf16.mxu0 %v3035_v6 }
 0x961   : > { %2682 = vmatpush3.bf16.msra.mxu1 %v3036_v7  ;;  %2704 = vmatpush3.bf16.msra.mxu0 %v3037_v8 }
 0x962   : > { %2683 = vmatprep.subr.bf16.mxu1 %v3038_v9  ;;  %2705 = vmatprep.subr.bf16.mxu0 %v3039_v10 }
 0x965   : > { %2684 = vmatpush3.bf16.msra.mxu1 %v3040_v11  ;;  %2706 = vmatpush3.bf16.msra.mxu0 %v3041_v12 }
 0x966   : > { %2685 = vmatprep.subr.bf16.mxu1 %v3042_v13  ;;  %2707 = vmatprep.subr.bf16.mxu0 %v3043_v14 }
 0x969   : > { %2686 = vmatpush3.bf16.msra.mxu1 %v3044_v15  ;;  %2708 = vmatpush3.bf16.msra.mxu0 %v3045_v16 }
 0x96a   : > { %2687 = vmatprep.subr.bf16.mxu1 %v3046_v17  ;;  %2709 = vmatprep.subr.bf16.mxu0 %v3047_v18 }
 0x96d   : > { %2688 = vmatpush3.bf16.msra.mxu1 %v3048_v19  ;;  %2710 = vmatpush3.bf16.msra.mxu0 %v3049_v20 }
 0xa23   : > { %v1716_v59 = vpop.f32.mrb[28].mxu1  ;;  %v1759_v29 = vpop.f32.mrb[16].mxu0 }
 0xa24   : > { %v3831_v30 = vadd.f32 %v1716_v59, %v1509_v23  ;;  %v3833_v31 = vadd.f32 %v1759_v29, %v1517_v24  ;;  %v1718_v33 = vpop.f32.mrb[29].mxu1  ;;  %v1761_v36 = vpop.f32.mrb[17].mxu0 }
 0xa25   : > { %v3835_v37 = vadd.f32 %v1718_v33, %v1513_v27  ;;  %v3837_v38 = vadd.f32 %v1761_v36, %v1521_v28  ;;  %v1720_v5 = vpop.f32.mrb[30].mxu1  ;;  %v1763_v39 = vpop.f32.mrb[18].mxu0 }
 0xa26   : > { %v1776_v34 = vmul.f32 0.044715, %v3831_v30  ;;  %v1778_v49 = vmul.f32 0.044715, %v3833_v31  ;;  %v1721_v35 = vadd.f32 %v1720_v5, %v1509_v23  ;;  %v1764_v40 = vadd.f32 %v1763_v39, %v1517_v24  ;;  %v1722_v41 = vpop.f32.mrb[31].mxu1  ;;  %v1765_v42 = vpop.f32.mrb[19].mxu0 }
 0xa27   : > { %v1777_v43 = vmul.f32 0.044715, %v3835_v37  ;;  %v1779_v44 = vmul.f32 0.044715, %v3837_v38  ;;  %v3843_v45 = vadd.f32 %v1722_v41, %v1513_v27  ;;  %v3845_v46 = vadd.f32 %v1765_v42, %v1521_v28 }
 0xa28   : > { %v1784_v47 = vmul.f32 %v1776_v34, %v3831_v30  ;;  %v1786_v48 = vmul.f32 %v1778_v49, %v3833_v31  ;;  %v1780_v52 = vmul.f32 0.044715, %v1721_v35  ;;  %v1782_v4 = vmul.f32 0.044715, %v1764_v40 }
 0xa29   : > { %v1785_v53 = vmul.f32 %v1777_v43, %v3835_v37  ;;  %v1787_v54 = vmul.f32 %v1779_v44, %v3837_v38  ;;  %v1781_v55 = vmul.f32 0.044715, %v3843_v45  ;;  %v1783_v56 = vmul.f32 0.044715, %v3845_v46 }
 0xa2a   : > { %v1792_v58 = vmul.f32 %v1784_v47, %v3831_v30  ;;  %v1794_v60 = vmul.f32 %v1786_v48, %v3833_v31  ;;  %v1788_v57 = vmul.f32 %v1780_v52, %v1721_v35  ;;  %v1790_v25 = vmul.f32 %v1782_v4, %v1764_v40 }
 0xa2b   : > { %v1793_v26 = vmul.f32 %v1785_v53, %v3835_v37  ;;  %v1795_v61 = vmul.f32 %v1787_v54, %v3837_v38  ;;  %v1789_v62 = vmul.f32 %v1781_v55, %v3843_v45  ;;  %v1791_v63 = vmul.f32 %v1783_v56, %v3845_v46 }
 0xa2c   : > { %v1800_v0 = vadd.f32 %v1792_v58, %v3831_v30  ;;  %v1802_v1 = vadd.f32 %v1794_v60, %v3833_v31  ;;  %v1796_v2 = vmul.f32 %v1788_v57, %v1721_v35  ;;  %v1798_v3 = vmul.f32 %v1790_v25, %v1764_v40 }
 0xa2d   : > { %v1797_v6 = vmul.f32 %v1789_v62, %v3843_v45  ;;  %v1799_v7 = vmul.f32 %v1791_v63, %v3845_v46  ;;  %v1801_v12 = vadd.f32 %v1793_v26, %v3835_v37  ;;  %v1803_v16 = vadd.f32 %v1795_v61, %v3837_v38  ;;  %v3106_v62 = vld [vmem:[%s3565_s22] sm:$0xff] }
 0xa2e   : > { %v1808_v8 = vmul.f32 0.7978846, %v1800_v0  ;;  %v1810_v9 = vmul.f32 0.7978846, %v1802_v1  ;;  %v1804_v10 = vadd.f32 %v1796_v2, %v1721_v35  ;;  %v1806_v11 = vadd.f32 %v1798_v3, %v1764_v40 }
 0xa2f   : > { %v1805_v13 = vadd.f32 %v1797_v6, %v3843_v45  ;;  %v1809_v17 = vmul.f32 0.7978846, %v1801_v12  ;;  %v1807_v19 = vadd.f32 %v1799_v7, %v3845_v46  ;;  %v1811_v20 = vmul.f32 0.7978846, %v1803_v16 }
 0xa30   : > { %3086 = vtanh.f32 %v1808_v8  ;;  %v1812_v14 = vmul.f32 0.7978846, %v1804_v10  ;;  %v1814_v15 = vmul.f32 0.7978846, %v1806_v11  ;;  %v1768_v29 = vmul.f32 0.5, %v3831_v30 }
 0xa31   : > { %3088 = vtanh.f32 %v1810_v9  ;;  %v1813_v18 = vmul.f32 0.7978846, %v1805_v13  ;;  %v1815_v21 = vmul.f32 0.7978846, %v1807_v19  ;;  %v1772_v33 = vmul.f32 0.5, %v1721_v35 }
 0xa32   : > { %3090 = vtanh.f32 %v1812_v14  ;;  %v1770_v39 = vmul.f32 0.5, %v3833_v31  ;;  %v1774_v34 = vmul.f32 0.5, %v1764_v40  ;;  %v1769_v42 = vmul.f32 0.5, %v3835_v37 }
 0xa33   : > { %3092 = vtanh.f32 %v1814_v15  ;;  %v1773_v52 = vmul.f32 0.5, %v3843_v45  ;;  %v1771_v35 = vmul.f32 0.5, %v3837_v38  ;;  %v1775_v55 = vmul.f32 0.5, %v3845_v46 }
 0xa34   : > { %3094 = vtanh.f32 %v1809_v17  ;;  %v1910_v61 = vsub.s32 5, %v3619_v32 }
 0xa35   : > { %3096 = vtanh.f32 %v1813_v18 }
 0xa36   : > { %3098 = vtanh.f32 %v1811_v20  ;;  %v1911_v46 = vrot.slane %v3106_v62, %v1910_v61 }
 0xa37   : > { %3100 = vtanh.f32 %v1815_v21 }
 0xa3a   : > { %v3087_v22 = vpop.eup %3086 }
 0xa3b   : > { %v3089_v23 = vpop.eup %3088  ;;  %v1824_v24 = vadd.f32 1.0, %v3087_v22 }
 0xa3c   : > { %v3091_v27 = vpop.eup %3090  ;;  %v1826_v28 = vadd.f32 1.0, %v3089_v23 }
 0xa3d   : > { %v3093_v59 = vpop.eup %3092  ;;  %v1828_v36 = vadd.f32 1.0, %v3091_v27  ;;  %v1832_v44 = vmul.f32 %v1824_v24, %v1768_v29 }
 0xa3e   : > { %v3095_v5 = vpop.eup %3094  ;;  %v1830_v49 = vadd.f32 1.0, %v3093_v59  ;;  %v1834_v53 = vmul.f32 %v1826_v28, %v1770_v39 }
 0xa3f   : > { %v3097_v41 = vpop.eup %3096  ;;  %v1825_v43 = vadd.f32 1.0, %v3095_v5  ;;  %v1836_v47 = vmul.f32 %v1828_v36, %v1772_v33  ;;  %v2218_v5 = vsub.s32 7, %v3619_v32 }
 0xa40   : > { %v3099_v48 = vpop.eup %3098  ;;  %v1829_v4 = vadd.f32 1.0, %v3097_v41  ;;  %v1838_v54 = vmul.f32 %v1830_v49, %v1774_v34 }
 0xa41   : > { %v3101_v30 = vpop.eup %3100  ;;  %v1827_v31 = vadd.f32 1.0, %v3099_v48  ;;  %v1840_v40 = vpack.c.bf16 %v1836_v47, %v1832_v44  ;;  %v1833_v56 = vmul.f32 %v1825_v43, %v1769_v42  ;;  %v2219_v49 = vrot.slane %v3106_v62, %v2218_v5 }
 0xa42   : > { %v1837_v58 = vmul.f32 %v1829_v4, %v1773_v52  ;;  %v1831_v37 = vadd.f32 1.0, %v3101_v30  ;;  %v1842_v60 = vpack.c.bf16 %v1838_v54, %v1834_v53  ;;  %v3107_v4 = vld [vmem:[%s3943_s7] sm:$0xff] (!%p2623_p4)   ;;  %v3108_v53 = vld [vmem:[%s3943_s7 + $0x8] sm:$0xff] (!%p2623_p4)   ;;  %v3109_v54 = vld [vmem:[%s3943_s7 + $0x10] sm:$0xff] (!%p2623_p4)  }
 0xa43   : > { %v1835_v25 = vmul.f32 %v1827_v31, %v1771_v35  ;;  %v3110_v30 = vld [vmem:[%s3943_s7 + $0x18] sm:$0xff] (!%p2623_p4)   ;;  %v3111_v35 = vld [vmem:[%s3943_s7 + $0x20] sm:$0xff] (!%p2623_p4)   ;;  %v3113_v31 = vld [vmem:[%s3943_s7 + $0x30] sm:$0xff] (!%p2623_p4)  }
 0xa44   : > { %v1841_v57 = vpack.c.bf16 %v1837_v58, %v1833_v56  ;;  %v1839_v26 = vmul.f32 %v1831_v37, %v1775_v55  ;;  %v3112_v55 = vld [vmem:[%s3943_s7 + $0x28] sm:$0xff] (!%p2623_p4)   ;;  %v2245_v58 = vld [vmem:[%s3971_s29] sm:$0x1] (!%p2623_p4) }
 0xa46   : > { %2136 = vmatprep.mubr.bf16.mxu1 %v1841_v57  ;;  %v1843_v45 = vpack.c.bf16 %v1839_v26, %v1835_v25 }
 0xa47   : > { %2137 = vmatmul.mubr.bf16.vlgmr.msra.gmra.mrb[32].mxu1 %v1840_v40  ;;  %v3114_v40 = vld [vmem:[%s3943_s7 + $0x38] sm:$0xff] (!%p2623_p4)  }
 0xa48   : > { %2177 = vmatprep.mubr.bf16.mxu0 %v1843_v45 }
 0xa49   : > { %2178 = vmatmul.mubr.bf16.vlgmr.msra.gmra.mrb[20].mxu0 %v1842_v60 }
 0xb1a   : > { %v2689_v38 = vpop.f32.mrb[32].mxu1 }
 0xb1b   : > { %v2690_v63 = vpop.f32.mrb[33].mxu1 }
 0xb1c   : > { %v2711_v0 = vpop.f32.mrb[20].mxu0  ;;  %v2691_v1 = vadd.f32 %v2690_v63, %v2689_v38  ;;  %v2692_v2 = vpop.f32.mrb[34].mxu1 }
 0xb1d   : > { %v2712_v3 = vpop.f32.mrb[21].mxu0  ;;  %v2693_v6 = vpop.f32.mrb[35].mxu1 }
 0xb1e   : > { %v2139_v7 = vadd.f32 %v2691_v1, %v1911_v46  ;;  %v2713_v8 = vadd.f32 %v2712_v3, %v2711_v0  ;;  %v2714_v9 = vpop.f32.mrb[22].mxu0  ;;  %v2694_v10 = vadd.f32 %v2693_v6, %v2692_v2 }
 0xb1f   : > { %v2715_v11 = vpop.f32.mrb[23].mxu0 }
 0xb20   : > { %v2180_v12 = vadd.f32 %v2713_v8, %v2139_v7  ;;  %v2142_v13 = vadd.f32 %v2694_v10, %v1911_v46  ;;  %v2716_v14 = vadd.f32 %v2715_v11, %v2714_v9 }
 0xb22   : > { %v2183_v15 = vadd.f32 %v2716_v14, %v2142_v13  ;;  %v2186_v16 = vadd.f32 %v2180_v12, %v3788_v50 }
 0xb24   : > { %2188 = vadd.xlane.f32.xlu1 %v2186_v16  ;;  %v2187_v17 = vadd.f32 %v2183_v15, %v3790_v51  ;;  %v2212_v51 = vsub.s32 6, %v3619_v32  ;;  %v3294_v32 = vmov (!%p2623_p4), 0.0  }
 0xb25   : > { %2814 = vmatprep.subr.bf16.mxu0 (!%p2623_p4), %v3294_v32  ;;  %2830 = vmatprep.mubr.msk.bf16.mxu0 (!%p2623_p4), %vm3295_vm6, %v3294_v32 }
 0xb26   : > { %2190 = vadd.xlane.f32.xlu0 %v2187_v17  ;;  %v2213_v39 = vrot.slane %v3106_v62, %v2212_v51  ;;  %2815 = vmatpush3.bf16.msra.mxu0 (!%p2623_p4), %v3107_v4 }
 0xb27   : > { %2816 = vmatprep.subr.bf16.mxu0 (!%p2623_p4), %v3294_v32 }
 0xb2a   : > { %2817 = vmatpush3.bf16.msra.mxu0 (!%p2623_p4), %v3108_v53 }
 0xb2b   : > { %2818 = vmatprep.subr.bf16.mxu0 (!%p2623_p4), %v3294_v32 }
 0xb2e   : > { %2819 = vmatpush3.bf16.msra.mxu0 (!%p2623_p4), %v3109_v54 }
 0xb2f   : > { %2820 = vmatprep.subr.bf16.mxu0 (!%p2623_p4), %v3294_v32 }
 0xb32   : > { %2821 = vmatpush3.bf16.msra.mxu0 (!%p2623_p4), %v3110_v30 }
 0xb33   : > { %2822 = vmatprep.subr.bf16.mxu0 (!%p2623_p4), %v3294_v32 }
 0xb36   : > { %2823 = vmatpush3.bf16.msra.mxu0 (!%p2623_p4), %v3111_v35 }
 0xb37   : > { %2824 = vmatprep.subr.bf16.mxu0 (!%p2623_p4), %v3294_v32 }
 0xb3a   : > { %2825 = vmatpush3.bf16.msra.mxu0 (!%p2623_p4), %v3112_v55 }
 0xb3b   : > { %2826 = vmatprep.subr.bf16.mxu0 (!%p2623_p4), %v3294_v32 }
 0xb3e   : > { %2827 = vmatpush3.bf16.msra.mxu0 (!%p2623_p4), %v3113_v31 }
 0xb3f   : > { %2828 = vmatprep.subr.bf16.mxu0 (!%p2623_p4), %v3294_v32 }
 0xb42   : > { %2829 = vmatpush3.bf16.msra.mxu0 (!%p2623_p4), %v3114_v40 }
 0xbb1   : > { %v2189_v18 = vpop.xlane.xlu1 %2188 }
 0xbb2   : > { %v2192_v19 = vmul.f32 0.0078125, %v2189_v18 }
 0xbb3   : > { %v2191_v20 = vpop.xlane.xlu0 %2190 }
 0xbb4   : > { %v2194_v21 = vsub.f32 %v2186_v16, %v2192_v19  ;;  %v2193_v22 = vmul.f32 0.0078125, %v2191_v20 }
 0xbb6   : > { %v2195_v23 = vsub.f32 %v2187_v17, %v2193_v22  ;;  %v2196_v24 = vmul.f32 %v2194_v21, %v2194_v21 }
 0xbb8   : > { %2198 = vadd.xlane.f32.xlu1 %v2196_v24  ;;  %v2197_v27 = vmul.f32 %v2195_v23, %v2195_v23 }
 0xbba   : > { %2200 = vadd.xlane.f32.xlu0 %v2197_v27 }
 0xc45   : > { %v2199_v28 = vpop.xlane.xlu1 %2198 }
 0xc46   : > { %v2202_v59 = vmul.f32 0.0078125, %v2199_v28 }
 0xc47   : > { %v2201_v29 = vpop.xlane.xlu0 %2200 }
 0xc48   : > { %v2204_v33 = vadd.f32 1e-12, %v2202_v59  ;;  %v2203_v36 = vmul.f32 0.0078125, %v2201_v29 }
 0xc4a   : > { %3102 = vrsqrt.f32 %v2204_v33  ;;  %v2205_v50 = vadd.f32 1e-12, %v2203_v36 }
 0xc4c   : > { %3104 = vrsqrt.f32 %v2205_v50 }
 0xc54   : > { %v3103_v34 = vpop.eup %3102 }
 0xc55   : > { %v2208_v41 = vmul.f32 %v3103_v34, %v2194_v21 }
 0xc56   : > { %v3105_v42 = vpop.eup %3104 }
 0xc57   : > { %v2214_v43 = vmul.f32 %v2213_v39, %v2208_v41  ;;  %v2209_v44 = vmul.f32 %v3105_v42, %v2195_v23  ;;  %2227 = sbr.rel (%p2623_p4) target bundleno = 3391 (0xd3f), region = 106 }
 0xc59   : > { %v2220_v47 = vadd.f32 %v2219_v49, %v2214_v43  ;;  %v2215_v48 = vmul.f32 %v2213_v39, %v2209_v44 }
 0xc5b   : > { %2222 = vst [vmem:[#allocation2] sm:$0xff] %v2220_v47  ;;  %v2221_v52 = vadd.f32 %v2219_v49, %v2215_v48  ;;  %v2228_v56 = vpack.c.bf16 (!%p2623_p4), %v2220_v47, %v2220_v47 }
 0xc5d   : > { %2223 = vst [vmem:[#allocation2 + $0x8] sm:$0xff] %v2221_v52  ;;  %2831 = vmatmul.mubr.bf16.vlgmr.msra.gmra.mrb[0].mxu0 (!%p2623_p4), %v2228_v56 }
 0xd30   : > { %v2328_v37 = vpop.f32.mrb[0].mxu0 }
 0xd31   : > { %v2329_v60 = vadd.f32 %v2328_v37, %v2245_v58  ;;  %v2832_v57 = vpop.f32.mrb[1].mxu0 }
 0xd32   : > { %v2331_v25 = vpop.f32.mrb[2].mxu0 }
 0xd33   : > { %3115 = vtanh.f32 %v2329_v60  ;;  %v2833_v26 = vpop.f32.mrb[3].mxu0 }
 0xd3d   : > { %v3116_v45 = vpop.eup %3115 }
 0xd3e   : > { %2335 = vst [vmem:[%s463_s24] sm:$0x1] %v3116_v45 }
 0xd3f PF: > { %s25_s16 = sadd.s32 1, %s3279_s16   ;;  %s3972_s15 = sld [smem:[#allocation14_spill]] }
 0xd40   : > { %p22_p11 = scmp.ge.s32.totalorder %s25_s16, 6   ;;  %s3973_s11 = sld [smem:[#allocation18_spill]] }
 0xd41   : > { %s3974_s13 = sld [smem:[#allocation15_spill]]  ;;  %s3975_s8 = sld [smem:[#allocation16_spill]] }
 0xd42   : > { %s3976_s2 = sld [smem:[#allocation17_spill]]  ;;  %s3977_s30 = smov %s3255_s10 }
 0xd43   : > { %s3979_s12 = smov %s3271_s14  ;;  %24 = sbr.rel (!%p22_p11) target bundleno = 11 (0xb), region = 176 }
 0xd45   : > { %s3978_s10 = smov %s3972_s15 }
 0xd47   : > { %s3980_s14 = smov %s3975_s8 }
 0xd48   : > { %s3981_s15 = smov %s3976_s2 }
 0xd4a   :  { %2353 = vsyncpa [#allocation6], 1 }
 0xd4b   :  { %2355 = vsyncpa [#allocation6 + $0x1], 1 }
 0xd4c   :  { %2356 = vsyncpa [#allocation8], 1 }
 0xd4d   :  { %2358 = vsyncpa [#allocation8 + $0x1], 1 }
 0xd4e   :  { %2359 = vsyncmov [#allocation4] }
 0xd51   :  { %s2360_s24 = vpop.sfrf %2359 }
 0xd52   :  { %p2634_p5 = scmp.ne.s32.totalorder %s2360_s24, 0 }
 0xd54   :  { %2364 = shalt.err (%p2634_p5)  }

</bundles_post_ra>
